<compile_context>
chip_gen: v7x
topology: tpu7x:2x2x1
jax: 0.10.0
libtpu: 0.0.40
codegen_flags: <defaults>
</compile_context>

<pallas_src>
import math

import jax
import jax.numpy as jnp
from jax.experimental import pallas as pl
from jax.experimental.pallas import tpu as pltpu

# ----------------------------- configuration --------------------------------
VOCAB = 100          # vocab_size
H = 32               # hidden_size
NH = 4               # num_attention_heads
HD = H // NH         # head dim
FF = 64              # intermediate_size
L = 2                # num_hidden_layers
MAXPOS = 16          # max_position_embeddings
S = 8                # sequence length
B = 2                # batch
NC = 2               # num_choices
BN = B * NC          # flattened batch*num_choices
TB = 2               # sequences per grid step (grid = BN // TB)
T = TB * S           # tokens per grid step
EPS = 1e-12          # layer_norm_eps
ATT_SCALE = 1.0 / math.sqrt(HD)
NVEC = 9             # packed per-layer vector rows (see init_params)

# rows of the packed per-layer vector array `lvec` (L, NVEC, H):
#   0: bq  1: bk  2: bv  3: bo  4: ln1_g  5: ln1_b  6: ffn_out_b  7: ln2_g  8: ln2_b


# ----------------------------- in-kernel helpers ----------------------------
def _layer_norm(x, gamma, beta):
    mu = jnp.mean(x, axis=-1, keepdims=True)
    var = jnp.mean((x - mu) ** 2, axis=-1, keepdims=True)
    return (x - mu) * jax.lax.rsqrt(var + EPS) * gamma + beta


def _gelu(x):
    # TODO(synk): HF BERT default is exact (erf) GELU; tanh approximation used here.
    c = math.sqrt(2.0 / math.pi)
    return 0.5 * x * (1.0 + jnp.tanh(c * (x + 0.044715 * x * x * x)))


# ----------------------------- fused Pallas kernel ---------------------------
def bert_fused_kernel(emb_ref, bias_ref, embln_ref, wqkvo_ref, wi_ref, wf_ref,
                      lvec_ref, lbi_ref, cls_ref):
    # Embedding LayerNorm on this grid step's (T, H) token slab (f32 VPU math).
    x = _layer_norm(emb_ref[...], embln_ref[0], embln_ref[1])          # (T, H)

    # Hoist the attention-mask bias broadcast out of the layer loop.
    # Merged-batch ordering is (head, sequence): index = h*TB + b.
    bias = bias_ref[...]                                                # (TB, 1, S)
    bias_m = jnp.broadcast_to(bias[None, :, :, :],
                              (NH, TB, S, S)).reshape(NH * TB, S, S)    # (NH*TB, S, S)

    for l in range(L):                              # static unroll over layers
        xb = x.astype(jnp.bfloat16)                 # bf16 into the MXU only

        # Q/K/V projections (Q weights pre-scaled by 1/sqrt(HD) at init).
        q = jnp.dot(xb, wqkvo_ref[l, 0], preferred_element_type=jnp.float32) + lvec_ref[l, 0]
        k = jnp.dot(xb, wqkvo_ref[l, 1], preferred_element_type=jnp.float32) + lvec_ref[l, 1]
        v = jnp.dot(xb, wqkvo_ref[l, 2], preferred_element_type=jnp.float32) + lvec_ref[l, 2]

        # Merge heads onto the batch axis: (NH*TB, S, HD).
        q3 = q.reshape(TB, S, H)
        k3 = k.reshape(TB, S, H)
        v3 = v.reshape(TB, S, H)
        q_m = jnp.concatenate([q3[:, :, h * HD:(h + 1) * HD] for h in range(NH)], axis=0)
        k_m = jnp.concatenate([k3[:, :, h * HD:(h + 1) * HD] for h in range(NH)], axis=0)
        v_m = jnp.concatenate([v3[:, :, h * HD:(h + 1) * HD] for h in range(NH)], axis=0)

        # ONE batched score einsum for all heads / sequences.
        sc = jnp.einsum('bqd,bkd->bqk',
                        q_m.astype(jnp.bfloat16), k_m.astype(jnp.bfloat16),
                        preferred_element_type=jnp.float32)             # (NH*TB, S, S)
        sc = sc + bias_m
        # No max-subtraction: scores are small, mask bias is a bounded -10000,
        # so f32 exp cannot overflow.
        e = jnp.exp(sc)
        p = e * pl.reciprocal(jnp.sum(e, axis=-1, keepdims=True), approx=True)

        # ONE batched context einsum.
        ctx_m = jnp.einsum('bqk,bkd->bqd',
                           p.astype(jnp.bfloat16), v_m.astype(jnp.bfloat16),
                           preferred_element_type=jnp.float32)          # (NH*TB, S, HD)

        # Reassemble heads on the lane axis, then ONE K=H output projection.
        ctx = jnp.concatenate(
            [ctx_m[h * TB:(h + 1) * TB].reshape(T, HD) for h in range(NH)],
            axis=-1)                                                    # (T, H)
        attn = jnp.dot(ctx.astype(jnp.bfloat16), wqkvo_ref[l, 3],
                       preferred_element_type=jnp.float32) + lvec_ref[l, 3]

        h1 = _layer_norm(x + attn, lvec_ref[l, 4], lvec_ref[l, 5])

        inter = _gelu(jnp.dot(h1.astype(jnp.bfloat16), wi_ref[l],
                              preferred_element_type=jnp.float32) + lbi_ref[l])
        ff = jnp.dot(inter.astype(jnp.bfloat16), wf_ref[l],
                     preferred_element_type=jnp.float32) + lvec_ref[l, 6]
        x = _layer_norm(h1 + ff, lvec_ref[l, 7], lvec_ref[l, 8])

    # Only the CLS row of each sequence is consumed downstream.
    cls_ref[...] = x.reshape(TB, S, H)[:, 0:1, :]                       # (TB, 1, H)


# ----------------------------- pallas_call wrapper ---------------------------
def bert_encoder_fused(emb_flat, bias3, p):
    grid = (BN // TB,)
    in_specs = [
        pl.BlockSpec((T, H), lambda i: (i, 0)),               # token slab per grid step
        pl.BlockSpec((TB, 1, S), lambda i: (i, 0, 0)),        # attention-mask bias
        pl.BlockSpec((2, H), lambda i: (0, 0)),               # emb LN gamma/beta (packed)
        pl.BlockSpec((L, 4, H, H), lambda i: (0, 0, 0, 0)),   # wq(scaled)/wk/wv/wo  bf16
        pl.BlockSpec((L, H, FF), lambda i: (0, 0, 0)),        # wi  bf16
        pl.BlockSpec((L, FF, H), lambda i: (0, 0, 0)),        # wf  bf16
        pl.BlockSpec((L, NVEC, H), lambda i: (0, 0, 0)),      # packed per-layer vectors f32
        pl.BlockSpec((L, FF), lambda i: (0, 0)),              # FFN intermediate bias f32
    ]
    out_specs = pl.BlockSpec((TB, 1, H), lambda i: (i, 0, 0))
    out_shape = jax.ShapeDtypeStruct((BN, 1, H), jnp.float32)

    return pl.pallas_call(
        bert_fused_kernel,
        out_shape=out_shape,
        grid=grid,
        in_specs=in_specs,
        out_specs=out_specs,
        compiler_params=pltpu.CompilerParams(
            # "parallel" lets v7x shard the two sequence blocks over both
            # TensorCores; weights have constant index_maps so they are not
            # re-DMA'd between grid steps.
            dimension_semantics=("parallel",)),
    )(emb_flat, bias3, p['embln'], p['wqkvo'], p['wi'], p['wf'], p['lvec'], p['lbi'])


# ----------------------------- parameter init --------------------------------
def init_params(key):
    """Builds kernel-ready parameters (bf16 matmul weights, packed vectors)."""
    def nrm(k, shape, scale=0.02):
        return (scale * jax.random.normal(k, shape)).astype(jnp.float32)

    ks = iter(jax.random.split(key, 10))
    wq = nrm(next(ks), (L, H, H)) * ATT_SCALE     # 1/sqrt(HD) folded into Q weights
    wk = nrm(next(ks), (L, H, H))
    wv = nrm(next(ks), (L, H, H))
    wo = nrm(next(ks), (L, H, H))
    wqkvo = jnp.stack([wq, wk, wv, wo], axis=1).astype(jnp.bfloat16)    # (L, 4, H, H)

    zeros_h = jnp.zeros((L, H), jnp.float32)
    ones_h = jnp.ones((L, H), jnp.float32)
    lvec = jnp.stack([
        zeros_h,   # 0: bq
        zeros_h,   # 1: bk
        zeros_h,   # 2: bv
        zeros_h,   # 3: bo
        ones_h,    # 4: ln1 gamma
        zeros_h,   # 5: ln1 beta
        zeros_h,   # 6: FFN output bias
        ones_h,    # 7: ln2 gamma
        zeros_h,   # 8: ln2 beta
    ], axis=1)                                                          # (L, NVEC, H)

    return {
        'word_emb': nrm(next(ks), (VOCAB, H)),
        'pos_emb': nrm(next(ks), (MAXPOS, H)),
        'embln': jnp.stack([jnp.ones((H,), jnp.float32),
                            jnp.zeros((H,), jnp.float32)], axis=0),     # (2, H)
        'wqkvo': wqkvo,
        'wi': nrm(next(ks), (L, H, FF)).astype(jnp.bfloat16),
        'wf': nrm(next(ks), (L, FF, H)).astype(jnp.bfloat16),
        'lvec': lvec,
        'lbi': jnp.zeros((L, FF), jnp.float32),
        'cls_w': nrm(next(ks), (H, 1)),
        'cls_b': jnp.zeros((1,), jnp.float32),
    }


# ----------------------------- full forward ----------------------------------
def bert_for_multiple_choice(params, input_ids, attention_mask, labels=None):
    b, nc, s = input_ids.shape
    flat_ids = input_ids.reshape(-1, s)                                 # (BN, S)
    flat_mask = attention_mask.reshape(-1, s).astype(jnp.float32)
    # HF extended attention mask: (1 - mask) * -10000, broadcast over queries.
    bias3 = ((1.0 - flat_mask) * -10000.0).reshape(-1, 1, s)            # (BN, 1, S)

    # Embedding gather is data-dependent -> plain JAX glue.
    # TODO(synk): token_type embeddings omitted (spec forward only passes ids/pos).
    we = jnp.take(params['word_emb'], flat_ids, axis=0)                 # (BN, S, H)
    pe = params['pos_emb'][:s][None, :, :]                              # (1, S, H)
    emb = (we + pe).astype(jnp.float32).reshape(-1, H)                  # (BNS, H)

    cls = bert_encoder_fused(emb, bias3, params).reshape(-1, H)         # (BN, H) CLS rows

    # pooled_output = last_hidden_state[:, 0, :]; dropout is identity in eval mode.
    pooled_output = cls
    # Tiny (BN,H)@(H,1) classifier left to XLA (avoids a lane-sparse kernel output).
    logits = cls @ params['cls_w'] + params['cls_b']                    # (BN, 1)
    reshaped_logits = logits.reshape(b, nc)

    loss = None
    if labels is not None:
        log_z = jax.nn.logsumexp(reshaped_logits, axis=-1)
        picked = jnp.take_along_axis(reshaped_logits, labels[:, None], axis=1)[:, 0]
        loss = jnp.mean(log_z - picked)                                 # CrossEntropyLoss (mean)

    return loss, reshaped_logits, pooled_output


# ----------------------------- driver ----------------------------------------
if __name__ == "__main__":
    key = jax.random.PRNGKey(0)
    k_param, k_ids, k_lab = jax.random.split(key, 3)

    params = init_params(k_param)
    input_ids = jax.random.randint(k_ids, (B, NC, S), 0, VOCAB, dtype=jnp.int32)
    attention_mask = jnp.ones((B, NC, S), dtype=jnp.int32)
    labels = jax.random.randint(k_lab, (B,), 0, NC, dtype=jnp.int32)

    loss, logits, pooled = bert_for_multiple_choice(params, input_ids, attention_mask, labels)
    jax.block_until_ready((loss, logits, pooled))

    assert logits.shape == (B, NC)
    assert pooled.shape == (B * NC, H)
    assert jnp.isfinite(loss)
    print("KERNEL_OK")
</pallas_src>

<mosaic_0001>
module attributes {stable_mosaic.version = 11 : i64} {
  func.func @bert_fused_kernel(%arg0: i32, %arg1: memref<16x32xf32, #tpu.memory_space<vmem>>, %arg2: memref<2x1x8xf32, #tpu.memory_space<vmem>>, %arg3: memref<2x32xf32, #tpu.memory_space<vmem>>, %arg4: memref<2x4x32x32xbf16, #tpu.memory_space<vmem>>, %arg5: memref<2x32x64xbf16, #tpu.memory_space<vmem>>, %arg6: memref<2x64x32xbf16, #tpu.memory_space<vmem>>, %arg7: memref<2x9x32xf32, #tpu.memory_space<vmem>>, %arg8: memref<2x64xf32, #tpu.memory_space<vmem>>, %arg9: memref<2x1x32xf32, #tpu.memory_space<vmem>>) attributes {dimension_semantics = [#tpu.dimension_semantics<parallel>], iteration_bounds = array<i64: 2>, scalar_prefetch = 0 : i64, scratch_operands = 0 : i64, tpu.core_type = #tpu.core_type<tc>, window_params = [{transform_indices = @transform_0, window_bounds = array<i64: 16, 32>}, {transform_indices = @transform_1, window_bounds = array<i64: 2, 1, 8>}, {pipeline_mode = #tpu.pipeline_mode<synchronous>, transform_indices = @transform_2, window_bounds = array<i64: 2, 32>}, {pipeline_mode = #tpu.pipeline_mode<synchronous>, transform_indices = @transform_3, window_bounds = array<i64: 2, 4, 32, 32>}, {pipeline_mode = #tpu.pipeline_mode<synchronous>, transform_indices = @transform_4, window_bounds = array<i64: 2, 32, 64>}, {pipeline_mode = #tpu.pipeline_mode<synchronous>, transform_indices = @transform_5, window_bounds = array<i64: 2, 64, 32>}, {pipeline_mode = #tpu.pipeline_mode<synchronous>, transform_indices = @transform_6, window_bounds = array<i64: 2, 9, 32>}, {pipeline_mode = #tpu.pipeline_mode<synchronous>, transform_indices = @transform_7, window_bounds = array<i64: 2, 64>}, {transform_indices = @transform_8, window_bounds = array<i64: 2, 1, 32>}]} {
    %c0 = arith.constant 0 : index
    %c0_0 = arith.constant 0 : index
    %0 = vector.load %arg1[%c0, %c0_0] : memref<16x32xf32, #tpu.memory_space<vmem>>, vector<16x32xf32>
    %c0_1 = arith.constant 0 : index
    %c0_2 = arith.constant 0 : index
    %1 = vector.load %arg3[%c0_1, %c0_2] : memref<2x32xf32, #tpu.memory_space<vmem>>, vector<1x32xf32>
    %2 = vector.shape_cast %1 : vector<1x32xf32> to vector<32xf32>
    %c1 = arith.constant 1 : index
    %c0_3 = arith.constant 0 : index
    %3 = vector.load %arg3[%c1, %c0_3] : memref<2x32xf32, #tpu.memory_space<vmem>>, vector<1x32xf32>
    %4 = vector.shape_cast %3 : vector<1x32xf32> to vector<32xf32>
    %cst = arith.constant dense<0.000000e+00> : vector<16xf32>
    %5 = vector.multi_reduction <add>, %0, %cst [1] : vector<16x32xf32> to vector<16xf32>
    %6 = vector.shape_cast %5 : vector<16xf32> to vector<16x1xf32>
    %cst_4 = arith.constant 3.200000e+01 : f32
    %7 = vector.broadcast %cst_4 : f32 to vector<16x1xf32>
    %8 = arith.divf %6, %7 : vector<16x1xf32>
    %9 = vector.broadcast %8 : vector<16x1xf32> to vector<16x32xf32>
    %10 = arith.subf %0, %9 : vector<16x32xf32>
    %11 = arith.mulf %10, %10 : vector<16x32xf32>
    %cst_5 = arith.constant dense<0.000000e+00> : vector<16xf32>
    %12 = vector.multi_reduction <add>, %11, %cst_5 [1] : vector<16x32xf32> to vector<16xf32>
    %13 = vector.shape_cast %12 : vector<16xf32> to vector<16x1xf32>
    %cst_6 = arith.constant 3.200000e+01 : f32
    %14 = vector.broadcast %cst_6 : f32 to vector<16x1xf32>
    %15 = arith.divf %13, %14 : vector<16x1xf32>
    %16 = vector.broadcast %8 : vector<16x1xf32> to vector<16x32xf32>
    %17 = arith.subf %0, %16 : vector<16x32xf32>
    %cst_7 = arith.constant 9.99999996E-13 : f32
    %18 = vector.broadcast %cst_7 : f32 to vector<16x1xf32>
    %19 = arith.addf %15, %18 : vector<16x1xf32>
    %20 = math.rsqrt %19 : vector<16x1xf32>
    %21 = vector.broadcast %20 : vector<16x1xf32> to vector<16x32xf32>
    %22 = arith.mulf %17, %21 : vector<16x32xf32>
    %23 = vector.shape_cast %2 : vector<32xf32> to vector<1x32xf32>
    %24 = vector.broadcast %23 : vector<1x32xf32> to vector<16x32xf32>
    %25 = arith.mulf %22, %24 : vector<16x32xf32>
    %26 = vector.shape_cast %4 : vector<32xf32> to vector<1x32xf32>
    %27 = vector.broadcast %26 : vector<1x32xf32> to vector<16x32xf32>
    %28 = arith.addf %25, %27 : vector<16x32xf32>
    %c0_8 = arith.constant 0 : index
    %c0_9 = arith.constant 0 : index
    %c0_10 = arith.constant 0 : index
    %29 = vector.load %arg2[%c0_8, %c0_9, %c0_10] : memref<2x1x8xf32, #tpu.memory_space<vmem>>, vector<2x1x8xf32>
    %30 = vector.shape_cast %29 : vector<2x1x8xf32> to vector<1x2x1x8xf32>
    %31 = vector.shape_cast %30 : vector<1x2x1x8xf32> to vector<1x2x1x8xf32>
    %32 = vector.broadcast %31 : vector<1x2x1x8xf32> to vector<4x2x8x8xf32>
    %33 = vector.shape_cast %32 : vector<4x2x8x8xf32> to vector<8x8x8xf32>
    %34 = arith.truncf %28 : vector<16x32xf32> to vector<16x32xbf16>
    %c0_11 = arith.constant 0 : index
    %c0_12 = arith.constant 0 : index
    %c0_13 = arith.constant 0 : index
    %c0_14 = arith.constant 0 : index
    %35 = vector.load %arg4[%c0_11, %c0_12, %c0_13, %c0_14] : memref<2x4x32x32xbf16, #tpu.memory_space<vmem>>, vector<1x1x32x32xbf16>
    %36 = vector.shape_cast %35 : vector<1x1x32x32xbf16> to vector<32x32xbf16>
    %cst_15 = arith.constant dense<0.000000e+00> : vector<16x32xf32>
    %37 = tpu.matmul %34, %36, %cst_15 {dimension_numbers = #tpu.dot_dimension_numbers<[1], [0], [0], [1], [0, 0, 1, 1], [], []>} : vector<16x32xbf16>, vector<32x32xbf16>, vector<16x32xf32> -> vector<16x32xf32>
    %c0_16 = arith.constant 0 : index
    %c0_17 = arith.constant 0 : index
    %c0_18 = arith.constant 0 : index
    %38 = vector.load %arg7[%c0_16, %c0_17, %c0_18] : memref<2x9x32xf32, #tpu.memory_space<vmem>>, vector<1x1x32xf32>
    %39 = vector.shape_cast %38 : vector<1x1x32xf32> to vector<32xf32>
    %40 = vector.shape_cast %39 : vector<32xf32> to vector<1x32xf32>
    %41 = vector.broadcast %40 : vector<1x32xf32> to vector<16x32xf32>
    %42 = arith.addf %37, %41 : vector<16x32xf32>
    %c0_19 = arith.constant 0 : index
    %c1_20 = arith.constant 1 : index
    %c0_21 = arith.constant 0 : index
    %c0_22 = arith.constant 0 : index
    %43 = vector.load %arg4[%c0_19, %c1_20, %c0_21, %c0_22] : memref<2x4x32x32xbf16, #tpu.memory_space<vmem>>, vector<1x1x32x32xbf16>
    %44 = vector.shape_cast %43 : vector<1x1x32x32xbf16> to vector<32x32xbf16>
    %cst_23 = arith.constant dense<0.000000e+00> : vector<16x32xf32>
    %45 = tpu.matmul %34, %44, %cst_23 {dimension_numbers = #tpu.dot_dimension_numbers<[1], [0], [0], [1], [0, 0, 1, 1], [], []>} : vector<16x32xbf16>, vector<32x32xbf16>, vector<16x32xf32> -> vector<16x32xf32>
    %c0_24 = arith.constant 0 : index
    %c1_25 = arith.constant 1 : index
    %c0_26 = arith.constant 0 : index
    %46 = vector.load %arg7[%c0_24, %c1_25, %c0_26] : memref<2x9x32xf32, #tpu.memory_space<vmem>>, vector<1x1x32xf32>
    %47 = vector.shape_cast %46 : vector<1x1x32xf32> to vector<32xf32>
    %48 = vector.shape_cast %47 : vector<32xf32> to vector<1x32xf32>
    %49 = vector.broadcast %48 : vector<1x32xf32> to vector<16x32xf32>
    %50 = arith.addf %45, %49 : vector<16x32xf32>
    %c0_27 = arith.constant 0 : index
    %c2 = arith.constant 2 : index
    %c0_28 = arith.constant 0 : index
    %c0_29 = arith.constant 0 : index
    %51 = vector.load %arg4[%c0_27, %c2, %c0_28, %c0_29] : memref<2x4x32x32xbf16, #tpu.memory_space<vmem>>, vector<1x1x32x32xbf16>
    %52 = vector.shape_cast %51 : vector<1x1x32x32xbf16> to vector<32x32xbf16>
    %cst_30 = arith.constant dense<0.000000e+00> : vector<16x32xf32>
    %53 = tpu.matmul %34, %52, %cst_30 {dimension_numbers = #tpu.dot_dimension_numbers<[1], [0], [0], [1], [0, 0, 1, 1], [], []>} : vector<16x32xbf16>, vector<32x32xbf16>, vector<16x32xf32> -> vector<16x32xf32>
    %c0_31 = arith.constant 0 : index
    %c2_32 = arith.constant 2 : index
    %c0_33 = arith.constant 0 : index
    %54 = vector.load %arg7[%c0_31, %c2_32, %c0_33] : memref<2x9x32xf32, #tpu.memory_space<vmem>>, vector<1x1x32xf32>
    %55 = vector.shape_cast %54 : vector<1x1x32xf32> to vector<32xf32>
    %56 = vector.shape_cast %55 : vector<32xf32> to vector<1x32xf32>
    %57 = vector.broadcast %56 : vector<1x32xf32> to vector<16x32xf32>
    %58 = arith.addf %53, %57 : vector<16x32xf32>
    %59 = vector.shape_cast %42 : vector<16x32xf32> to vector<2x8x32xf32>
    %60 = vector.shape_cast %50 : vector<16x32xf32> to vector<2x8x32xf32>
    %61 = vector.shape_cast %58 : vector<16x32xf32> to vector<2x8x32xf32>
    %62 = vector.extract_strided_slice %59 {offsets = [0, 0, 0], sizes = [2, 8, 8], strides = [1, 1, 1]} : vector<2x8x32xf32> to vector<2x8x8xf32>
    %63 = vector.extract_strided_slice %59 {offsets = [0, 0, 8], sizes = [2, 8, 8], strides = [1, 1, 1]} : vector<2x8x32xf32> to vector<2x8x8xf32>
    %64 = vector.extract_strided_slice %59 {offsets = [0, 0, 16], sizes = [2, 8, 8], strides = [1, 1, 1]} : vector<2x8x32xf32> to vector<2x8x8xf32>
    %65 = vector.extract_strided_slice %59 {offsets = [0, 0, 24], sizes = [2, 8, 8], strides = [1, 1, 1]} : vector<2x8x32xf32> to vector<2x8x8xf32>
    %66 = tpu.concatenate %62, %63, %64, %65 in 0 : vector<2x8x8xf32>, vector<2x8x8xf32>, vector<2x8x8xf32>, vector<2x8x8xf32> -> vector<8x8x8xf32>
    %67 = vector.extract_strided_slice %60 {offsets = [0, 0, 0], sizes = [2, 8, 8], strides = [1, 1, 1]} : vector<2x8x32xf32> to vector<2x8x8xf32>
    %68 = vector.extract_strided_slice %60 {offsets = [0, 0, 8], sizes = [2, 8, 8], strides = [1, 1, 1]} : vector<2x8x32xf32> to vector<2x8x8xf32>
    %69 = vector.extract_strided_slice %60 {offsets = [0, 0, 16], sizes = [2, 8, 8], strides = [1, 1, 1]} : vector<2x8x32xf32> to vector<2x8x8xf32>
    %70 = vector.extract_strided_slice %60 {offsets = [0, 0, 24], sizes = [2, 8, 8], strides = [1, 1, 1]} : vector<2x8x32xf32> to vector<2x8x8xf32>
    %71 = tpu.concatenate %67, %68, %69, %70 in 0 : vector<2x8x8xf32>, vector<2x8x8xf32>, vector<2x8x8xf32>, vector<2x8x8xf32> -> vector<8x8x8xf32>
    %72 = vector.extract_strided_slice %61 {offsets = [0, 0, 0], sizes = [2, 8, 8], strides = [1, 1, 1]} : vector<2x8x32xf32> to vector<2x8x8xf32>
    %73 = vector.extract_strided_slice %61 {offsets = [0, 0, 8], sizes = [2, 8, 8], strides = [1, 1, 1]} : vector<2x8x32xf32> to vector<2x8x8xf32>
    %74 = vector.extract_strided_slice %61 {offsets = [0, 0, 16], sizes = [2, 8, 8], strides = [1, 1, 1]} : vector<2x8x32xf32> to vector<2x8x8xf32>
    %75 = vector.extract_strided_slice %61 {offsets = [0, 0, 24], sizes = [2, 8, 8], strides = [1, 1, 1]} : vector<2x8x32xf32> to vector<2x8x8xf32>
    %76 = tpu.concatenate %72, %73, %74, %75 in 0 : vector<2x8x8xf32>, vector<2x8x8xf32>, vector<2x8x8xf32>, vector<2x8x8xf32> -> vector<8x8x8xf32>
    %77 = arith.truncf %66 : vector<8x8x8xf32> to vector<8x8x8xbf16>
    %78 = arith.truncf %71 : vector<8x8x8xf32> to vector<8x8x8xbf16>
    "tpu.trace_start"() <{level = 10 : i32, message = "bqd,bkd->bqk"}> : () -> ()
    %cst_34 = arith.constant dense<0.000000e+00> : vector<8x8x8xf32>
    %79 = tpu.matmul %77, %78, %cst_34 {dimension_numbers = #tpu.dot_dimension_numbers<[2], [2], [1], [1], [0, 0, 0, 1, 1, 1], [0], [0]>} : vector<8x8x8xbf16>, vector<8x8x8xbf16>, vector<8x8x8xf32> -> vector<8x8x8xf32>
    "tpu.trace_stop"() : () -> ()
    %80 = arith.addf %79, %33 : vector<8x8x8xf32>
    %81 = math.exp %80 : vector<8x8x8xf32>
    %cst_35 = arith.constant dense<0.000000e+00> : vector<8x8xf32>
    %82 = vector.multi_reduction <add>, %81, %cst_35 [2] : vector<8x8x8xf32> to vector<8x8xf32>
    %83 = vector.shape_cast %82 : vector<8x8xf32> to vector<8x8x1xf32>
    %84 = tpu.reciprocal %83 {approx = true} : vector<8x8x1xf32> -> vector<8x8x1xf32>
    %85 = vector.broadcast %84 : vector<8x8x1xf32> to vector<8x8x8xf32>
    %86 = arith.mulf %81, %85 : vector<8x8x8xf32>
    %87 = arith.truncf %86 : vector<8x8x8xf32> to vector<8x8x8xbf16>
    %88 = arith.truncf %76 : vector<8x8x8xf32> to vector<8x8x8xbf16>
    "tpu.trace_start"() <{level = 10 : i32, message = "bqk,bkd->bqd"}> : () -> ()
    %cst_36 = arith.constant dense<0.000000e+00> : vector<8x8x8xf32>
    %89 = tpu.matmul %87, %88, %cst_36 {dimension_numbers = #tpu.dot_dimension_numbers<[2], [1], [1], [2], [0, 0, 0, 1, 1, 2], [0], [0]>} : vector<8x8x8xbf16>, vector<8x8x8xbf16>, vector<8x8x8xf32> -> vector<8x8x8xf32>
    "tpu.trace_stop"() : () -> ()
    %90 = vector.extract_strided_slice %89 {offsets = [0, 0, 0], sizes = [2, 8, 8], strides = [1, 1, 1]} : vector<8x8x8xf32> to vector<2x8x8xf32>
    %91 = vector.shape_cast %90 : vector<2x8x8xf32> to vector<16x8xf32>
    %92 = vector.extract_strided_slice %89 {offsets = [2, 0, 0], sizes = [2, 8, 8], strides = [1, 1, 1]} : vector<8x8x8xf32> to vector<2x8x8xf32>
    %93 = vector.shape_cast %92 : vector<2x8x8xf32> to vector<16x8xf32>
    %94 = vector.extract_strided_slice %89 {offsets = [4, 0, 0], sizes = [2, 8, 8], strides = [1, 1, 1]} : vector<8x8x8xf32> to vector<2x8x8xf32>
    %95 = vector.shape_cast %94 : vector<2x8x8xf32> to vector<16x8xf32>
    %96 = vector.extract_strided_slice %89 {offsets = [6, 0, 0], sizes = [2, 8, 8], strides = [1, 1, 1]} : vector<8x8x8xf32> to vector<2x8x8xf32>
    %97 = vector.shape_cast %96 : vector<2x8x8xf32> to vector<16x8xf32>
    %98 = tpu.concatenate %91, %93, %95, %97 in 1 : vector<16x8xf32>, vector<16x8xf32>, vector<16x8xf32>, vector<16x8xf32> -> vector<16x32xf32>
    %99 = arith.truncf %98 : vector<16x32xf32> to vector<16x32xbf16>
    %c0_37 = arith.constant 0 : index
    %c3 = arith.constant 3 : index
    %c0_38 = arith.constant 0 : index
    %c0_39 = arith.constant 0 : index
    %100 = vector.load %arg4[%c0_37, %c3, %c0_38, %c0_39] : memref<2x4x32x32xbf16, #tpu.memory_space<vmem>>, vector<1x1x32x32xbf16>
    %101 = vector.shape_cast %100 : vector<1x1x32x32xbf16> to vector<32x32xbf16>
    %cst_40 = arith.constant dense<0.000000e+00> : vector<16x32xf32>
    %102 = tpu.matmul %99, %101, %cst_40 {dimension_numbers = #tpu.dot_dimension_numbers<[1], [0], [0], [1], [0, 0, 1, 1], [], []>} : vector<16x32xbf16>, vector<32x32xbf16>, vector<16x32xf32> -> vector<16x32xf32>
    %c0_41 = arith.constant 0 : index
    %c3_42 = arith.constant 3 : index
    %c0_43 = arith.constant 0 : index
    %103 = vector.load %arg7[%c0_41, %c3_42, %c0_43] : memref<2x9x32xf32, #tpu.memory_space<vmem>>, vector<1x1x32xf32>
    %104 = vector.shape_cast %103 : vector<1x1x32xf32> to vector<32xf32>
    %105 = vector.shape_cast %104 : vector<32xf32> to vector<1x32xf32>
    %106 = vector.broadcast %105 : vector<1x32xf32> to vector<16x32xf32>
    %107 = arith.addf %102, %106 : vector<16x32xf32>
    %108 = arith.addf %28, %107 : vector<16x32xf32>
    %c0_44 = arith.constant 0 : index
    %c4 = arith.constant 4 : index
    %c0_45 = arith.constant 0 : index
    %109 = vector.load %arg7[%c0_44, %c4, %c0_45] : memref<2x9x32xf32, #tpu.memory_space<vmem>>, vector<1x1x32xf32>
    %110 = vector.shape_cast %109 : vector<1x1x32xf32> to vector<32xf32>
    %c0_46 = arith.constant 0 : index
    %c5 = arith.constant 5 : index
    %c0_47 = arith.constant 0 : index
    %111 = vector.load %arg7[%c0_46, %c5, %c0_47] : memref<2x9x32xf32, #tpu.memory_space<vmem>>, vector<1x1x32xf32>
    %112 = vector.shape_cast %111 : vector<1x1x32xf32> to vector<32xf32>
    %cst_48 = arith.constant dense<0.000000e+00> : vector<16xf32>
    %113 = vector.multi_reduction <add>, %108, %cst_48 [1] : vector<16x32xf32> to vector<16xf32>
    %114 = vector.shape_cast %113 : vector<16xf32> to vector<16x1xf32>
    %cst_49 = arith.constant 3.200000e+01 : f32
    %115 = vector.broadcast %cst_49 : f32 to vector<16x1xf32>
    %116 = arith.divf %114, %115 : vector<16x1xf32>
    %117 = vector.broadcast %116 : vector<16x1xf32> to vector<16x32xf32>
    %118 = arith.subf %108, %117 : vector<16x32xf32>
    %119 = arith.mulf %118, %118 : vector<16x32xf32>
    %cst_50 = arith.constant dense<0.000000e+00> : vector<16xf32>
    %120 = vector.multi_reduction <add>, %119, %cst_50 [1] : vector<16x32xf32> to vector<16xf32>
    %121 = vector.shape_cast %120 : vector<16xf32> to vector<16x1xf32>
    %cst_51 = arith.constant 3.200000e+01 : f32
    %122 = vector.broadcast %cst_51 : f32 to vector<16x1xf32>
    %123 = arith.divf %121, %122 : vector<16x1xf32>
    %124 = vector.broadcast %116 : vector<16x1xf32> to vector<16x32xf32>
    %125 = arith.subf %108, %124 : vector<16x32xf32>
    %cst_52 = arith.constant 9.99999996E-13 : f32
    %126 = vector.broadcast %cst_52 : f32 to vector<16x1xf32>
    %127 = arith.addf %123, %126 : vector<16x1xf32>
    %128 = math.rsqrt %127 : vector<16x1xf32>
    %129 = vector.broadcast %128 : vector<16x1xf32> to vector<16x32xf32>
    %130 = arith.mulf %125, %129 : vector<16x32xf32>
    %131 = vector.shape_cast %110 : vector<32xf32> to vector<1x32xf32>
    %132 = vector.broadcast %131 : vector<1x32xf32> to vector<16x32xf32>
    %133 = arith.mulf %130, %132 : vector<16x32xf32>
    %134 = vector.shape_cast %112 : vector<32xf32> to vector<1x32xf32>
    %135 = vector.broadcast %134 : vector<1x32xf32> to vector<16x32xf32>
    %136 = arith.addf %133, %135 : vector<16x32xf32>
    %137 = arith.truncf %136 : vector<16x32xf32> to vector<16x32xbf16>
    %c0_53 = arith.constant 0 : index
    %c0_54 = arith.constant 0 : index
    %c0_55 = arith.constant 0 : index
    %138 = vector.load %arg5[%c0_53, %c0_54, %c0_55] : memref<2x32x64xbf16, #tpu.memory_space<vmem>>, vector<1x32x64xbf16>
    %139 = vector.shape_cast %138 : vector<1x32x64xbf16> to vector<32x64xbf16>
    %cst_56 = arith.constant dense<0.000000e+00> : vector<16x64xf32>
    %140 = tpu.matmul %137, %139, %cst_56 {dimension_numbers = #tpu.dot_dimension_numbers<[1], [0], [0], [1], [0, 0, 1, 1], [], []>} : vector<16x32xbf16>, vector<32x64xbf16>, vector<16x64xf32> -> vector<16x64xf32>
    %c0_57 = arith.constant 0 : index
    %c0_58 = arith.constant 0 : index
    %141 = vector.load %arg8[%c0_57, %c0_58] : memref<2x64xf32, #tpu.memory_space<vmem>>, vector<1x64xf32>
    %142 = vector.shape_cast %141 : vector<1x64xf32> to vector<64xf32>
    %143 = vector.shape_cast %142 : vector<64xf32> to vector<1x64xf32>
    %144 = vector.broadcast %143 : vector<1x64xf32> to vector<16x64xf32>
    %145 = arith.addf %140, %144 : vector<16x64xf32>
    %cst_59 = arith.constant 5.000000e-01 : f32
    %146 = vector.broadcast %cst_59 : f32 to vector<16x64xf32>
    %147 = arith.mulf %146, %145 : vector<16x64xf32>
    %cst_60 = arith.constant 4.471500e-02 : f32
    %148 = vector.broadcast %cst_60 : f32 to vector<16x64xf32>
    %149 = arith.mulf %148, %145 : vector<16x64xf32>
    %150 = arith.mulf %149, %145 : vector<16x64xf32>
    %151 = arith.mulf %150, %145 : vector<16x64xf32>
    %152 = arith.addf %145, %151 : vector<16x64xf32>
    %cst_61 = arith.constant 0.797884583 : f32
    %153 = vector.broadcast %cst_61 : f32 to vector<16x64xf32>
    %154 = arith.mulf %153, %152 : vector<16x64xf32>
    %155 = math.tanh %154 : vector<16x64xf32>
    %cst_62 = arith.constant 1.000000e+00 : f32
    %156 = vector.broadcast %cst_62 : f32 to vector<16x64xf32>
    %157 = arith.addf %156, %155 : vector<16x64xf32>
    %158 = arith.mulf %147, %157 : vector<16x64xf32>
    %159 = arith.truncf %158 : vector<16x64xf32> to vector<16x64xbf16>
    %c0_63 = arith.constant 0 : index
    %c0_64 = arith.constant 0 : index
    %c0_65 = arith.constant 0 : index
    %160 = vector.load %arg6[%c0_63, %c0_64, %c0_65] : memref<2x64x32xbf16, #tpu.memory_space<vmem>>, vector<1x64x32xbf16>
    %161 = vector.shape_cast %160 : vector<1x64x32xbf16> to vector<64x32xbf16>
    %cst_66 = arith.constant dense<0.000000e+00> : vector<16x32xf32>
    %162 = tpu.matmul %159, %161, %cst_66 {dimension_numbers = #tpu.dot_dimension_numbers<[1], [0], [0], [1], [0, 0, 1, 1], [], []>} : vector<16x64xbf16>, vector<64x32xbf16>, vector<16x32xf32> -> vector<16x32xf32>
    %c0_67 = arith.constant 0 : index
    %c6 = arith.constant 6 : index
    %c0_68 = arith.constant 0 : index
    %163 = vector.load %arg7[%c0_67, %c6, %c0_68] : memref<2x9x32xf32, #tpu.memory_space<vmem>>, vector<1x1x32xf32>
    %164 = vector.shape_cast %163 : vector<1x1x32xf32> to vector<32xf32>
    %165 = vector.shape_cast %164 : vector<32xf32> to vector<1x32xf32>
    %166 = vector.broadcast %165 : vector<1x32xf32> to vector<16x32xf32>
    %167 = arith.addf %162, %166 : vector<16x32xf32>
    %168 = arith.addf %136, %167 : vector<16x32xf32>
    %c0_69 = arith.constant 0 : index
    %c7 = arith.constant 7 : index
    %c0_70 = arith.constant 0 : index
    %169 = vector.load %arg7[%c0_69, %c7, %c0_70] : memref<2x9x32xf32, #tpu.memory_space<vmem>>, vector<1x1x32xf32>
    %170 = vector.shape_cast %169 : vector<1x1x32xf32> to vector<32xf32>
    %c0_71 = arith.constant 0 : index
    %c8 = arith.constant 8 : index
    %c0_72 = arith.constant 0 : index
    %171 = vector.load %arg7[%c0_71, %c8, %c0_72] : memref<2x9x32xf32, #tpu.memory_space<vmem>>, vector<1x1x32xf32>
    %172 = vector.shape_cast %171 : vector<1x1x32xf32> to vector<32xf32>
    %cst_73 = arith.constant dense<0.000000e+00> : vector<16xf32>
    %173 = vector.multi_reduction <add>, %168, %cst_73 [1] : vector<16x32xf32> to vector<16xf32>
    %174 = vector.shape_cast %173 : vector<16xf32> to vector<16x1xf32>
    %cst_74 = arith.constant 3.200000e+01 : f32
    %175 = vector.broadcast %cst_74 : f32 to vector<16x1xf32>
    %176 = arith.divf %174, %175 : vector<16x1xf32>
    %177 = vector.broadcast %176 : vector<16x1xf32> to vector<16x32xf32>
    %178 = arith.subf %168, %177 : vector<16x32xf32>
    %179 = arith.mulf %178, %178 : vector<16x32xf32>
    %cst_75 = arith.constant dense<0.000000e+00> : vector<16xf32>
    %180 = vector.multi_reduction <add>, %179, %cst_75 [1] : vector<16x32xf32> to vector<16xf32>
    %181 = vector.shape_cast %180 : vector<16xf32> to vector<16x1xf32>
    %cst_76 = arith.constant 3.200000e+01 : f32
    %182 = vector.broadcast %cst_76 : f32 to vector<16x1xf32>
    %183 = arith.divf %181, %182 : vector<16x1xf32>
    %184 = vector.broadcast %176 : vector<16x1xf32> to vector<16x32xf32>
    %185 = arith.subf %168, %184 : vector<16x32xf32>
    %cst_77 = arith.constant 9.99999996E-13 : f32
    %186 = vector.broadcast %cst_77 : f32 to vector<16x1xf32>
    %187 = arith.addf %183, %186 : vector<16x1xf32>
    %188 = math.rsqrt %187 : vector<16x1xf32>
    %189 = vector.broadcast %188 : vector<16x1xf32> to vector<16x32xf32>
    %190 = arith.mulf %185, %189 : vector<16x32xf32>
    %191 = vector.shape_cast %170 : vector<32xf32> to vector<1x32xf32>
    %192 = vector.broadcast %191 : vector<1x32xf32> to vector<16x32xf32>
    %193 = arith.mulf %190, %192 : vector<16x32xf32>
    %194 = vector.shape_cast %172 : vector<32xf32> to vector<1x32xf32>
    %195 = vector.broadcast %194 : vector<1x32xf32> to vector<16x32xf32>
    %196 = arith.addf %193, %195 : vector<16x32xf32>
    %197 = arith.truncf %196 : vector<16x32xf32> to vector<16x32xbf16>
    %c1_78 = arith.constant 1 : index
    %c0_79 = arith.constant 0 : index
    %c0_80 = arith.constant 0 : index
    %c0_81 = arith.constant 0 : index
    %198 = vector.load %arg4[%c1_78, %c0_79, %c0_80, %c0_81] : memref<2x4x32x32xbf16, #tpu.memory_space<vmem>>, vector<1x1x32x32xbf16>
    %199 = vector.shape_cast %198 : vector<1x1x32x32xbf16> to vector<32x32xbf16>
    %cst_82 = arith.constant dense<0.000000e+00> : vector<16x32xf32>
    %200 = tpu.matmul %197, %199, %cst_82 {dimension_numbers = #tpu.dot_dimension_numbers<[1], [0], [0], [1], [0, 0, 1, 1], [], []>} : vector<16x32xbf16>, vector<32x32xbf16>, vector<16x32xf32> -> vector<16x32xf32>
    %c1_83 = arith.constant 1 : index
    %c0_84 = arith.constant 0 : index
    %c0_85 = arith.constant 0 : index
    %201 = vector.load %arg7[%c1_83, %c0_84, %c0_85] : memref<2x9x32xf32, #tpu.memory_space<vmem>>, vector<1x1x32xf32>
    %202 = vector.shape_cast %201 : vector<1x1x32xf32> to vector<32xf32>
    %203 = vector.shape_cast %202 : vector<32xf32> to vector<1x32xf32>
    %204 = vector.broadcast %203 : vector<1x32xf32> to vector<16x32xf32>
    %205 = arith.addf %200, %204 : vector<16x32xf32>
    %c1_86 = arith.constant 1 : index
    %c1_87 = arith.constant 1 : index
    %c0_88 = arith.constant 0 : index
    %c0_89 = arith.constant 0 : index
    %206 = vector.load %arg4[%c1_86, %c1_87, %c0_88, %c0_89] : memref<2x4x32x32xbf16, #tpu.memory_space<vmem>>, vector<1x1x32x32xbf16>
    %207 = vector.shape_cast %206 : vector<1x1x32x32xbf16> to vector<32x32xbf16>
    %cst_90 = arith.constant dense<0.000000e+00> : vector<16x32xf32>
    %208 = tpu.matmul %197, %207, %cst_90 {dimension_numbers = #tpu.dot_dimension_numbers<[1], [0], [0], [1], [0, 0, 1, 1], [], []>} : vector<16x32xbf16>, vector<32x32xbf16>, vector<16x32xf32> -> vector<16x32xf32>
    %c1_91 = arith.constant 1 : index
    %c1_92 = arith.constant 1 : index
    %c0_93 = arith.constant 0 : index
    %209 = vector.load %arg7[%c1_91, %c1_92, %c0_93] : memref<2x9x32xf32, #tpu.memory_space<vmem>>, vector<1x1x32xf32>
    %210 = vector.shape_cast %209 : vector<1x1x32xf32> to vector<32xf32>
    %211 = vector.shape_cast %210 : vector<32xf32> to vector<1x32xf32>
    %212 = vector.broadcast %211 : vector<1x32xf32> to vector<16x32xf32>
    %213 = arith.addf %208, %212 : vector<16x32xf32>
    %c1_94 = arith.constant 1 : index
    %c2_95 = arith.constant 2 : index
    %c0_96 = arith.constant 0 : index
    %c0_97 = arith.constant 0 : index
    %214 = vector.load %arg4[%c1_94, %c2_95, %c0_96, %c0_97] : memref<2x4x32x32xbf16, #tpu.memory_space<vmem>>, vector<1x1x32x32xbf16>
    %215 = vector.shape_cast %214 : vector<1x1x32x32xbf16> to vector<32x32xbf16>
    %cst_98 = arith.constant dense<0.000000e+00> : vector<16x32xf32>
    %216 = tpu.matmul %197, %215, %cst_98 {dimension_numbers = #tpu.dot_dimension_numbers<[1], [0], [0], [1], [0, 0, 1, 1], [], []>} : vector<16x32xbf16>, vector<32x32xbf16>, vector<16x32xf32> -> vector<16x32xf32>
    %c1_99 = arith.constant 1 : index
    %c2_100 = arith.constant 2 : index
    %c0_101 = arith.constant 0 : index
    %217 = vector.load %arg7[%c1_99, %c2_100, %c0_101] : memref<2x9x32xf32, #tpu.memory_space<vmem>>, vector<1x1x32xf32>
    %218 = vector.shape_cast %217 : vector<1x1x32xf32> to vector<32xf32>
    %219 = vector.shape_cast %218 : vector<32xf32> to vector<1x32xf32>
    %220 = vector.broadcast %219 : vector<1x32xf32> to vector<16x32xf32>
    %221 = arith.addf %216, %220 : vector<16x32xf32>
    %222 = vector.shape_cast %205 : vector<16x32xf32> to vector<2x8x32xf32>
    %223 = vector.shape_cast %213 : vector<16x32xf32> to vector<2x8x32xf32>
    %224 = vector.shape_cast %221 : vector<16x32xf32> to vector<2x8x32xf32>
    %225 = vector.extract_strided_slice %222 {offsets = [0, 0, 0], sizes = [2, 8, 8], strides = [1, 1, 1]} : vector<2x8x32xf32> to vector<2x8x8xf32>
    %226 = vector.extract_strided_slice %222 {offsets = [0, 0, 8], sizes = [2, 8, 8], strides = [1, 1, 1]} : vector<2x8x32xf32> to vector<2x8x8xf32>
    %227 = vector.extract_strided_slice %222 {offsets = [0, 0, 16], sizes = [2, 8, 8], strides = [1, 1, 1]} : vector<2x8x32xf32> to vector<2x8x8xf32>
    %228 = vector.extract_strided_slice %222 {offsets = [0, 0, 24], sizes = [2, 8, 8], strides = [1, 1, 1]} : vector<2x8x32xf32> to vector<2x8x8xf32>
    %229 = tpu.concatenate %225, %226, %227, %228 in 0 : vector<2x8x8xf32>, vector<2x8x8xf32>, vector<2x8x8xf32>, vector<2x8x8xf32> -> vector<8x8x8xf32>
    %230 = vector.extract_strided_slice %223 {offsets = [0, 0, 0], sizes = [2, 8, 8], strides = [1, 1, 1]} : vector<2x8x32xf32> to vector<2x8x8xf32>
    %231 = vector.extract_strided_slice %223 {offsets = [0, 0, 8], sizes = [2, 8, 8], strides = [1, 1, 1]} : vector<2x8x32xf32> to vector<2x8x8xf32>
    %232 = vector.extract_strided_slice %223 {offsets = [0, 0, 16], sizes = [2, 8, 8], strides = [1, 1, 1]} : vector<2x8x32xf32> to vector<2x8x8xf32>
    %233 = vector.extract_strided_slice %223 {offsets = [0, 0, 24], sizes = [2, 8, 8], strides = [1, 1, 1]} : vector<2x8x32xf32> to vector<2x8x8xf32>
    %234 = tpu.concatenate %230, %231, %232, %233 in 0 : vector<2x8x8xf32>, vector<2x8x8xf32>, vector<2x8x8xf32>, vector<2x8x8xf32> -> vector<8x8x8xf32>
    %235 = vector.extract_strided_slice %224 {offsets = [0, 0, 0], sizes = [2, 8, 8], strides = [1, 1, 1]} : vector<2x8x32xf32> to vector<2x8x8xf32>
    %236 = vector.extract_strided_slice %224 {offsets = [0, 0, 8], sizes = [2, 8, 8], strides = [1, 1, 1]} : vector<2x8x32xf32> to vector<2x8x8xf32>
    %237 = vector.extract_strided_slice %224 {offsets = [0, 0, 16], sizes = [2, 8, 8], strides = [1, 1, 1]} : vector<2x8x32xf32> to vector<2x8x8xf32>
    %238 = vector.extract_strided_slice %224 {offsets = [0, 0, 24], sizes = [2, 8, 8], strides = [1, 1, 1]} : vector<2x8x32xf32> to vector<2x8x8xf32>
    %239 = tpu.concatenate %235, %236, %237, %238 in 0 : vector<2x8x8xf32>, vector<2x8x8xf32>, vector<2x8x8xf32>, vector<2x8x8xf32> -> vector<8x8x8xf32>
    %240 = arith.truncf %229 : vector<8x8x8xf32> to vector<8x8x8xbf16>
    %241 = arith.truncf %234 : vector<8x8x8xf32> to vector<8x8x8xbf16>
    "tpu.trace_start"() <{level = 10 : i32, message = "bqd,bkd->bqk"}> : () -> ()
    %cst_102 = arith.constant dense<0.000000e+00> : vector<8x8x8xf32>
    %242 = tpu.matmul %240, %241, %cst_102 {dimension_numbers = #tpu.dot_dimension_numbers<[2], [2], [1], [1], [0, 0, 0, 1, 1, 1], [0], [0]>} : vector<8x8x8xbf16>, vector<8x8x8xbf16>, vector<8x8x8xf32> -> vector<8x8x8xf32>
    "tpu.trace_stop"() : () -> ()
    %243 = arith.addf %242, %33 : vector<8x8x8xf32>
    %244 = math.exp %243 : vector<8x8x8xf32>
    %cst_103 = arith.constant dense<0.000000e+00> : vector<8x8xf32>
    %245 = vector.multi_reduction <add>, %244, %cst_103 [2] : vector<8x8x8xf32> to vector<8x8xf32>
    %246 = vector.shape_cast %245 : vector<8x8xf32> to vector<8x8x1xf32>
    %247 = tpu.reciprocal %246 {approx = true} : vector<8x8x1xf32> -> vector<8x8x1xf32>
    %248 = vector.broadcast %247 : vector<8x8x1xf32> to vector<8x8x8xf32>
    %249 = arith.mulf %244, %248 : vector<8x8x8xf32>
    %250 = arith.truncf %249 : vector<8x8x8xf32> to vector<8x8x8xbf16>
    %251 = arith.truncf %239 : vector<8x8x8xf32> to vector<8x8x8xbf16>
    "tpu.trace_start"() <{level = 10 : i32, message = "bqk,bkd->bqd"}> : () -> ()
    %cst_104 = arith.constant dense<0.000000e+00> : vector<8x8x8xf32>
    %252 = tpu.matmul %250, %251, %cst_104 {dimension_numbers = #tpu.dot_dimension_numbers<[2], [1], [1], [2], [0, 0, 0, 1, 1, 2], [0], [0]>} : vector<8x8x8xbf16>, vector<8x8x8xbf16>, vector<8x8x8xf32> -> vector<8x8x8xf32>
    "tpu.trace_stop"() : () -> ()
    %253 = vector.extract_strided_slice %252 {offsets = [0, 0, 0], sizes = [2, 8, 8], strides = [1, 1, 1]} : vector<8x8x8xf32> to vector<2x8x8xf32>
    %254 = vector.shape_cast %253 : vector<2x8x8xf32> to vector<16x8xf32>
    %255 = vector.extract_strided_slice %252 {offsets = [2, 0, 0], sizes = [2, 8, 8], strides = [1, 1, 1]} : vector<8x8x8xf32> to vector<2x8x8xf32>
    %256 = vector.shape_cast %255 : vector<2x8x8xf32> to vector<16x8xf32>
    %257 = vector.extract_strided_slice %252 {offsets = [4, 0, 0], sizes = [2, 8, 8], strides = [1, 1, 1]} : vector<8x8x8xf32> to vector<2x8x8xf32>
    %258 = vector.shape_cast %257 : vector<2x8x8xf32> to vector<16x8xf32>
    %259 = vector.extract_strided_slice %252 {offsets = [6, 0, 0], sizes = [2, 8, 8], strides = [1, 1, 1]} : vector<8x8x8xf32> to vector<2x8x8xf32>
    %260 = vector.shape_cast %259 : vector<2x8x8xf32> to vector<16x8xf32>
    %261 = tpu.concatenate %254, %256, %258, %260 in 1 : vector<16x8xf32>, vector<16x8xf32>, vector<16x8xf32>, vector<16x8xf32> -> vector<16x32xf32>
    %262 = arith.truncf %261 : vector<16x32xf32> to vector<16x32xbf16>
    %c1_105 = arith.constant 1 : index
    %c3_106 = arith.constant 3 : index
    %c0_107 = arith.constant 0 : index
    %c0_108 = arith.constant 0 : index
    %263 = vector.load %arg4[%c1_105, %c3_106, %c0_107, %c0_108] : memref<2x4x32x32xbf16, #tpu.memory_space<vmem>>, vector<1x1x32x32xbf16>
    %264 = vector.shape_cast %263 : vector<1x1x32x32xbf16> to vector<32x32xbf16>
    %cst_109 = arith.constant dense<0.000000e+00> : vector<16x32xf32>
    %265 = tpu.matmul %262, %264, %cst_109 {dimension_numbers = #tpu.dot_dimension_numbers<[1], [0], [0], [1], [0, 0, 1, 1], [], []>} : vector<16x32xbf16>, vector<32x32xbf16>, vector<16x32xf32> -> vector<16x32xf32>
    %c1_110 = arith.constant 1 : index
    %c3_111 = arith.constant 3 : index
    %c0_112 = arith.constant 0 : index
    %266 = vector.load %arg7[%c1_110, %c3_111, %c0_112] : memref<2x9x32xf32, #tpu.memory_space<vmem>>, vector<1x1x32xf32>
    %267 = vector.shape_cast %266 : vector<1x1x32xf32> to vector<32xf32>
    %268 = vector.shape_cast %267 : vector<32xf32> to vector<1x32xf32>
    %269 = vector.broadcast %268 : vector<1x32xf32> to vector<16x32xf32>
    %270 = arith.addf %265, %269 : vector<16x32xf32>
    %271 = arith.addf %196, %270 : vector<16x32xf32>
    %c1_113 = arith.constant 1 : index
    %c4_114 = arith.constant 4 : index
    %c0_115 = arith.constant 0 : index
    %272 = vector.load %arg7[%c1_113, %c4_114, %c0_115] : memref<2x9x32xf32, #tpu.memory_space<vmem>>, vector<1x1x32xf32>
    %273 = vector.shape_cast %272 : vector<1x1x32xf32> to vector<32xf32>
    %c1_116 = arith.constant 1 : index
    %c5_117 = arith.constant 5 : index
    %c0_118 = arith.constant 0 : index
    %274 = vector.load %arg7[%c1_116, %c5_117, %c0_118] : memref<2x9x32xf32, #tpu.memory_space<vmem>>, vector<1x1x32xf32>
    %275 = vector.shape_cast %274 : vector<1x1x32xf32> to vector<32xf32>
    %cst_119 = arith.constant dense<0.000000e+00> : vector<16xf32>
    %276 = vector.multi_reduction <add>, %271, %cst_119 [1] : vector<16x32xf32> to vector<16xf32>
    %277 = vector.shape_cast %276 : vector<16xf32> to vector<16x1xf32>
    %cst_120 = arith.constant 3.200000e+01 : f32
    %278 = vector.broadcast %cst_120 : f32 to vector<16x1xf32>
    %279 = arith.divf %277, %278 : vector<16x1xf32>
    %280 = vector.broadcast %279 : vector<16x1xf32> to vector<16x32xf32>
    %281 = arith.subf %271, %280 : vector<16x32xf32>
    %282 = arith.mulf %281, %281 : vector<16x32xf32>
    %cst_121 = arith.constant dense<0.000000e+00> : vector<16xf32>
    %283 = vector.multi_reduction <add>, %282, %cst_121 [1] : vector<16x32xf32> to vector<16xf32>
    %284 = vector.shape_cast %283 : vector<16xf32> to vector<16x1xf32>
    %cst_122 = arith.constant 3.200000e+01 : f32
    %285 = vector.broadcast %cst_122 : f32 to vector<16x1xf32>
    %286 = arith.divf %284, %285 : vector<16x1xf32>
    %287 = vector.broadcast %279 : vector<16x1xf32> to vector<16x32xf32>
    %288 = arith.subf %271, %287 : vector<16x32xf32>
    %cst_123 = arith.constant 9.99999996E-13 : f32
    %289 = vector.broadcast %cst_123 : f32 to vector<16x1xf32>
    %290 = arith.addf %286, %289 : vector<16x1xf32>
    %291 = math.rsqrt %290 : vector<16x1xf32>
    %292 = vector.broadcast %291 : vector<16x1xf32> to vector<16x32xf32>
    %293 = arith.mulf %288, %292 : vector<16x32xf32>
    %294 = vector.shape_cast %273 : vector<32xf32> to vector<1x32xf32>
    %295 = vector.broadcast %294 : vector<1x32xf32> to vector<16x32xf32>
    %296 = arith.mulf %293, %295 : vector<16x32xf32>
    %297 = vector.shape_cast %275 : vector<32xf32> to vector<1x32xf32>
    %298 = vector.broadcast %297 : vector<1x32xf32> to vector<16x32xf32>
    %299 = arith.addf %296, %298 : vector<16x32xf32>
    %300 = arith.truncf %299 : vector<16x32xf32> to vector<16x32xbf16>
    %c1_124 = arith.constant 1 : index
    %c0_125 = arith.constant 0 : index
    %c0_126 = arith.constant 0 : index
    %301 = vector.load %arg5[%c1_124, %c0_125, %c0_126] : memref<2x32x64xbf16, #tpu.memory_space<vmem>>, vector<1x32x64xbf16>
    %302 = vector.shape_cast %301 : vector<1x32x64xbf16> to vector<32x64xbf16>
    %cst_127 = arith.constant dense<0.000000e+00> : vector<16x64xf32>
    %303 = tpu.matmul %300, %302, %cst_127 {dimension_numbers = #tpu.dot_dimension_numbers<[1], [0], [0], [1], [0, 0, 1, 1], [], []>} : vector<16x32xbf16>, vector<32x64xbf16>, vector<16x64xf32> -> vector<16x64xf32>
    %c1_128 = arith.constant 1 : index
    %c0_129 = arith.constant 0 : index
    %304 = vector.load %arg8[%c1_128, %c0_129] : memref<2x64xf32, #tpu.memory_space<vmem>>, vector<1x64xf32>
    %305 = vector.shape_cast %304 : vector<1x64xf32> to vector<64xf32>
    %306 = vector.shape_cast %305 : vector<64xf32> to vector<1x64xf32>
    %307 = vector.broadcast %306 : vector<1x64xf32> to vector<16x64xf32>
    %308 = arith.addf %303, %307 : vector<16x64xf32>
    %cst_130 = arith.constant 5.000000e-01 : f32
    %309 = vector.broadcast %cst_130 : f32 to vector<16x64xf32>
    %310 = arith.mulf %309, %308 : vector<16x64xf32>
    %cst_131 = arith.constant 4.471500e-02 : f32
    %311 = vector.broadcast %cst_131 : f32 to vector<16x64xf32>
    %312 = arith.mulf %311, %308 : vector<16x64xf32>
    %313 = arith.mulf %312, %308 : vector<16x64xf32>
    %314 = arith.mulf %313, %308 : vector<16x64xf32>
    %315 = arith.addf %308, %314 : vector<16x64xf32>
    %cst_132 = arith.constant 0.797884583 : f32
    %316 = vector.broadcast %cst_132 : f32 to vector<16x64xf32>
    %317 = arith.mulf %316, %315 : vector<16x64xf32>
    %318 = math.tanh %317 : vector<16x64xf32>
    %cst_133 = arith.constant 1.000000e+00 : f32
    %319 = vector.broadcast %cst_133 : f32 to vector<16x64xf32>
    %320 = arith.addf %319, %318 : vector<16x64xf32>
    %321 = arith.mulf %310, %320 : vector<16x64xf32>
    %322 = arith.truncf %321 : vector<16x64xf32> to vector<16x64xbf16>
    %c1_134 = arith.constant 1 : index
    %c0_135 = arith.constant 0 : index
    %c0_136 = arith.constant 0 : index
    %323 = vector.load %arg6[%c1_134, %c0_135, %c0_136] : memref<2x64x32xbf16, #tpu.memory_space<vmem>>, vector<1x64x32xbf16>
    %324 = vector.shape_cast %323 : vector<1x64x32xbf16> to vector<64x32xbf16>
    %cst_137 = arith.constant dense<0.000000e+00> : vector<16x32xf32>
    %325 = tpu.matmul %322, %324, %cst_137 {dimension_numbers = #tpu.dot_dimension_numbers<[1], [0], [0], [1], [0, 0, 1, 1], [], []>} : vector<16x64xbf16>, vector<64x32xbf16>, vector<16x32xf32> -> vector<16x32xf32>
    %c1_138 = arith.constant 1 : index
    %c6_139 = arith.constant 6 : index
    %c0_140 = arith.constant 0 : index
    %326 = vector.load %arg7[%c1_138, %c6_139, %c0_140] : memref<2x9x32xf32, #tpu.memory_space<vmem>>, vector<1x1x32xf32>
    %327 = vector.shape_cast %326 : vector<1x1x32xf32> to vector<32xf32>
    %328 = vector.shape_cast %327 : vector<32xf32> to vector<1x32xf32>
    %329 = vector.broadcast %328 : vector<1x32xf32> to vector<16x32xf32>
    %330 = arith.addf %325, %329 : vector<16x32xf32>
    %331 = arith.addf %299, %330 : vector<16x32xf32>
    %c1_141 = arith.constant 1 : index
    %c7_142 = arith.constant 7 : index
    %c0_143 = arith.constant 0 : index
    %332 = vector.load %arg7[%c1_141, %c7_142, %c0_143] : memref<2x9x32xf32, #tpu.memory_space<vmem>>, vector<1x1x32xf32>
    %333 = vector.shape_cast %332 : vector<1x1x32xf32> to vector<32xf32>
    %c1_144 = arith.constant 1 : index
    %c8_145 = arith.constant 8 : index
    %c0_146 = arith.constant 0 : index
    %334 = vector.load %arg7[%c1_144, %c8_145, %c0_146] : memref<2x9x32xf32, #tpu.memory_space<vmem>>, vector<1x1x32xf32>
    %335 = vector.shape_cast %334 : vector<1x1x32xf32> to vector<32xf32>
    %cst_147 = arith.constant dense<0.000000e+00> : vector<16xf32>
    %336 = vector.multi_reduction <add>, %331, %cst_147 [1] : vector<16x32xf32> to vector<16xf32>
    %337 = vector.shape_cast %336 : vector<16xf32> to vector<16x1xf32>
    %cst_148 = arith.constant 3.200000e+01 : f32
    %338 = vector.broadcast %cst_148 : f32 to vector<16x1xf32>
    %339 = arith.divf %337, %338 : vector<16x1xf32>
    %340 = vector.broadcast %339 : vector<16x1xf32> to vector<16x32xf32>
    %341 = arith.subf %331, %340 : vector<16x32xf32>
    %342 = arith.mulf %341, %341 : vector<16x32xf32>
    %cst_149 = arith.constant dense<0.000000e+00> : vector<16xf32>
    %343 = vector.multi_reduction <add>, %342, %cst_149 [1] : vector<16x32xf32> to vector<16xf32>
    %344 = vector.shape_cast %343 : vector<16xf32> to vector<16x1xf32>
    %cst_150 = arith.constant 3.200000e+01 : f32
    %345 = vector.broadcast %cst_150 : f32 to vector<16x1xf32>
    %346 = arith.divf %344, %345 : vector<16x1xf32>
    %347 = vector.broadcast %339 : vector<16x1xf32> to vector<16x32xf32>
    %348 = arith.subf %331, %347 : vector<16x32xf32>
    %cst_151 = arith.constant 9.99999996E-13 : f32
    %349 = vector.broadcast %cst_151 : f32 to vector<16x1xf32>
    %350 = arith.addf %346, %349 : vector<16x1xf32>
    %351 = math.rsqrt %350 : vector<16x1xf32>
    %352 = vector.broadcast %351 : vector<16x1xf32> to vector<16x32xf32>
    %353 = arith.mulf %348, %352 : vector<16x32xf32>
    %354 = vector.shape_cast %333 : vector<32xf32> to vector<1x32xf32>
    %355 = vector.broadcast %354 : vector<1x32xf32> to vector<16x32xf32>
    %356 = arith.mulf %353, %355 : vector<16x32xf32>
    %357 = vector.shape_cast %335 : vector<32xf32> to vector<1x32xf32>
    %358 = vector.broadcast %357 : vector<1x32xf32> to vector<16x32xf32>
    %359 = arith.addf %356, %358 : vector<16x32xf32>
    %360 = vector.shape_cast %359 : vector<16x32xf32> to vector<2x8x32xf32>
    %361 = vector.extract_strided_slice %360 {offsets = [0, 0, 0], sizes = [2, 1, 32], strides = [1, 1, 1]} : vector<2x8x32xf32> to vector<2x1x32xf32>
    %c0_152 = arith.constant 0 : index
    %c0_153 = arith.constant 0 : index
    %c0_154 = arith.constant 0 : index
    %362 = vector.load %arg9[%c0_152, %c0_153, %c0_154] : memref<2x1x32xf32, #tpu.memory_space<vmem>>, vector<2x1x32xf32>
    tpu.vector_store %arg9[%c0_152, %c0_153, %c0_154], %361 {strides = array<i32>} : memref<2x1x32xf32, #tpu.memory_space<vmem>>, vector<2x1x32xf32>,
    return
  }
  func.func @transform_0(%arg0: i32) -> (i32, i32) {
    %c0_i32 = arith.constant 0 : i32
    %c0_i32_0 = arith.constant 0 : i32
    return %arg0, %c0_i32 : i32, i32
  }
  func.func @transform_1(%arg0: i32) -> (i32, i32, i32) {
    %c0_i32 = arith.constant 0 : i32
    %c0_i32_0 = arith.constant 0 : i32
    %c0_i32_1 = arith.constant 0 : i32
    return %arg0, %c0_i32, %c0_i32_0 : i32, i32, i32
  }
  func.func @transform_2(%arg0: i32) -> (i32, i32) {
    %c0_i32 = arith.constant 0 : i32
    %c0_i32_0 = arith.constant 0 : i32
    %c0_i32_1 = arith.constant 0 : i32
    return %c0_i32, %c0_i32_0 : i32, i32
  }
  func.func @transform_3(%arg0: i32) -> (i32, i32, i32, i32) {
    %c0_i32 = arith.constant 0 : i32
    %c0_i32_0 = arith.constant 0 : i32
    %c0_i32_1 = arith.constant 0 : i32
    %c0_i32_2 = arith.constant 0 : i32
    %c0_i32_3 = arith.constant 0 : i32
    return %c0_i32, %c0_i32_0, %c0_i32_1, %c0_i32_2 : i32, i32, i32, i32
  }
  func.func @transform_4(%arg0: i32) -> (i32, i32, i32) {
    %c0_i32 = arith.constant 0 : i32
    %c0_i32_0 = arith.constant 0 : i32
    %c0_i32_1 = arith.constant 0 : i32
    %c0_i32_2 = arith.constant 0 : i32
    return %c0_i32, %c0_i32_0, %c0_i32_1 : i32, i32, i32
  }
  func.func @transform_5(%arg0: i32) -> (i32, i32, i32) {
    %c0_i32 = arith.constant 0 : i32
    %c0_i32_0 = arith.constant 0 : i32
    %c0_i32_1 = arith.constant 0 : i32
    %c0_i32_2 = arith.constant 0 : i32
    return %c0_i32, %c0_i32_0, %c0_i32_1 : i32, i32, i32
  }
  func.func @transform_6(%arg0: i32) -> (i32, i32, i32) {
    %c0_i32 = arith.constant 0 : i32
    %c0_i32_0 = arith.constant 0 : i32
    %c0_i32_1 = arith.constant 0 : i32
    %c0_i32_2 = arith.constant 0 : i32
    return %c0_i32, %c0_i32_0, %c0_i32_1 : i32, i32, i32
  }
  func.func @transform_7(%arg0: i32) -> (i32, i32) {
    %c0_i32 = arith.constant 0 : i32
    %c0_i32_0 = arith.constant 0 : i32
    %c0_i32_1 = arith.constant 0 : i32
    return %c0_i32, %c0_i32_0 : i32, i32
  }
  func.func @transform_8(%arg0: i32) -> (i32, i32, i32) {
    %c0_i32 = arith.constant 0 : i32
    %c0_i32_0 = arith.constant 0 : i32
    %c0_i32_1 = arith.constant 0 : i32
    return %arg0, %c0_i32, %c0_i32_0 : i32, i32, i32
  }
}

</mosaic_0001>

<bundles_post_ra>
// kernel: tpu_custom_call.1
= control target key start
LH: loop header
LB: loop body
LE: loop exit
PB: predicated region body
PF: predicated region fallthrough
CT: control target
= control target key end

     0   :  { %s5440_s0 = inlined_call_operand.hbm [shape: f32[32,32], index: 0, kind: input, shape index: {}]   ;;  %s5441_s1 = inlined_call_operand.hbm [shape: f32[4,1,8], index: 1, kind: input, shape index: {}]   ;;  %s5442_s2 = inlined_call_operand.hbm [shape: f32[2,32], index: 2, kind: input, shape index: {}]   ;;  %s5443_s3 = inlined_call_operand.vmem [shape: bf16[2,4,32,32], index: 3, kind: input, shape index: {}]   ;;  %s5444_s4 = inlined_call_operand.hbm [shape: bf16[2,32,64], index: 4, kind: input, shape index: {}]   ;;  %s5445_s5 = inlined_call_operand.vmem [shape: bf16[2,64,32], index: 5, kind: input, shape index: {}]   ;;  %s5446_s6 = inlined_call_operand.vmem [shape: f32[2,9,32], index: 6, kind: input, shape index: {}]   ;;  %s5447_s7 = inlined_call_operand.vmem [shape: f32[2,64], index: 7, kind: input, shape index: {}]   ;;  %s5448_s8 = inlined_call_operand.hbm [shape: f32[4,1,32], index: 8, kind: output, shape index: {}]  }
   0x1   :  { %5459 = sst [smem:[#allocation21_spill]] %s5442_s2 }
   0x2   :  { %13 = vsyncpa [#allocation3], 0 }
   0x3   :  { %15 = vsyncpa [#allocation3 + $0x1], 0 }
   0x4   :  { %16 = vsyncpa [#allocation6], 0 }
   0x5   :  { %18 = vsyncpa [#allocation6 + $0x1], 0 }
   0x6   :  { %19 = vsyncpa [#allocation9], 0 }
   0x7   :  { %20 = vsyncpa [#allocation4], 0 }
   0x8   :  { %22 = vsyncpa [#allocation4 + $0x1], 0  ;;  %s4596_s27 = smov 0   ;;  %s4598_s28 = smov 0  }
   0x9   :  { %s4600_s29 = smov 0   ;;  %s4602_s30 = smov 0  }
   0xa LB: > { %5460 = sst [smem:[#allocation16_spill]] %s4517_s27  ;;  %s4617_s9 = sadd.s32 4294967295, %s4529_s30   ;;  %s4529_s30 = sphi %s4602_s30, %s5486_s30   ;;  %s4525_s29 = sphi %s4600_s29, %s5488_s29   ;;  %s4521_s28 = sphi %s4598_s28, %s5490_s28   ;;  %s4517_s27 = sphi %s4596_s27, %s5489_s27  }
   0xb   : > { %5461 = sst [smem:[#allocation17_spill]] %s4525_s29  ;;  %s3440_s10 = sadd.s32 4294967294, %s4529_s30  }
   0xc   : > { %s4621_s11 = sadd.s32 1, %s4529_s30   ;;  %s35_s12 = sadd.s32 1, %s4525_s29 }
   0xd   : > { %5462 = sst [smem:[#allocation18_spill]] %s4621_s11  ;;  %s32_s13 = ssub.s32 %s4529_s30, %s4621_s11 }
   0xe   : > { %p42_p0 = scmp.ne.s32.totalorder %s4525_s29, %s4521_s28  ;;  %p33_p1 = scmp.eq.s32.totalorder %s32_s13, 0 }
   0xf   : > { %p43_p2 = scmp.eq.s32.totalorder %s4529_s30, 0  ;;  %p48_p3 = scmp.ne.s32.totalorder %s4521_s28, %s4517_s27 }
  0x10   : > { %p5449_p4 = scmp.eq.s32.totalorder %s4617_s9, 0  ;;  %p224_p7 = scmp.eq.s32.totalorder %s4617_s9, 1 }
  0x11   : > { %s4633_s14 = scalar_select %p33_p1, %s4525_s29, %s35_s12  }
  0x12   : > { %p4635_p5 = por %p43_p2, %p42_p0  ;;  %p4641_p6 = por %p5449_p4, %p48_p3 }
  0x13   : > { %5463 = sst [smem:[#allocation19_spill]] %s4633_s14  ;;  %p230_p8 = scmp.eq.s32.totalorder %s3440_s10, 1 }
  0x14   : > { %s5465_s16 = scalar_select %p4641_p6, 1, 0 }
  0x15   : > { %p3441_p9 = scmp.ge.s32.totalorder %s4529_s30, 1  ;;  %p237_p10 = scmp.lt.s32.totalorder %s4529_s30, 3 }
  0x16   : > { %p4648_p11 = por %p224_p7, %p42_p0  ;;  %p4652_p12 = por %p230_p8, %p48_p3 }
  0x17   : > { %p4656_p13 = pnand %p3441_p9, %p237_p10  ;;  %s4531_s20 = smov [#allocation7]  }
  0x18   : > { %s5466_s17 = scalar_select %p4648_p11, 1, 0 }
  0x19   : > { %s5467_s18 = scalar_select %p4652_p12, 1, 0 }
  0x1a   : > { %s5469_s19 = scalar_select %p4656_p13, 1, 0 }
  0x1b   : > { %5468 = sst [smem:[#allocation20_spill]] %s5467_s18  ;;  %p4020_p2 = pneg %p4656_p13 }
  0x1c   : > { %s250_s21 = sshll.u32 %s4531_s20, 4  ;;  %p4040_p4 = scmp.lt.s32.totalorder %s4529_s30, 2  ;;  %s251_s21 = int_to_ptr.vmem [resolvable:$true] %s250_s21 }
  0x1d   : > { %p5470_p0 = scmp.eq.s32.totalorder %s4617_s9, 0  ;;  %s4532_s24 = smov [#allocation8]  }
  0x1e   : > { %p4672_p3 = pnand %p4040_p4, %p4635_p5  ;;  %s263_s25 = sshll.u32 %s4532_s24, 4  ;;  %s4676_s25 = int_to_ptr.vmem [resolvable:$true] %s263_s25 }
  0x1f   : > { %p4666_p7 = pnand %p4020_p2, %p5470_p0  ;;  %s5473_s2 = sld [smem:[#allocation21_spill]] }
  0x20   : > { %s5472_s23 = scalar_select %p4672_p3, 1, 0 }
  0x21   : > { %p4337_p9 = pneg %p4666_p7 }
  0x25   : > { %s4335_s12 = scalar_lea.hbm %s5473_s2, 32 }
  0x26   : > { %p4336_p8 = scmp.ne.s32.totalorder %s5473_s2, %s4335_s12  ;;  %p4342_p10 = scmp.lt.u32.totalorder %s4335_s12, %s5473_s2 }
  0x28   : > { %p4338_p4 = pnand %p4337_p9, %p4336_p8 }
  0x2a   : > { %p4339_p5 = pneg %p4338_p4 }
  0x2c   : > { %p4344_p2 = pnand %p4342_p10, %p4339_p5 }
  0x2e   : > { %4347 = shalt.err (!%p4344_p2)
}
  0x2f   : > { %s4348_s24 = scalar_lea.vmem %s251_s21, 32  ;;  %p4356_p11 = scmp.lt.s32.totalorder %s251_s21, %s251_s21 }
  0x30   : > { %p4349_p0 = scmp.ne.s32.totalorder %s251_s21, %s4348_s24  ;;  %p4357_p6 = scmp.lt.s32.totalorder %s4348_s24, %s4348_s24 }
  0x32   : > { %p4351_p1 = pnand %p4349_p0, %p4337_p9  ;;  %p4358_p13 = por %p4357_p6, %p4356_p11 }
  0x34   : > { %p4352_p12 = pneg %p4351_p1 }
  0x36   : > { %p4359_p3 = pnand %p4358_p13, %p4352_p12 }
  0x38   : > { %4362 = shalt.err (!%p4359_p3)
}
  0x39   : > { %4023 = dma.hbm_to_vmem [thread:$0]  (!%p4666_p7), %s5473_s2, 32, %s251_s21, [#allocation6]  }
  0x3a   : > { %s4701_s14 = sand.u32 1, %s4525_s29   ;;  %s4363_s20 = scalar_lea.hbm %s5444_s4, 512 }
  0x3b   : > { %p4364_p6 = scmp.ne.s32.totalorder %s5444_s4, %s4363_s20  ;;  %p4370_p13 = scmp.lt.u32.totalorder %s4363_s20, %s5444_s4 }
  0x3d   : > { %p4366_p11 = pnand %p4364_p6, %p4337_p9 }
  0x3f   : > { %p4367_p12 = pneg %p4366_p11 }
  0x41   : > { %p4372_p1 = pnand %p4370_p13, %p4367_p12 }
  0x43   : > { %4375 = shalt.err (!%p4372_p1)
}
  0x44   : > { %s4376_s21 = scalar_lea.vmem %s4676_s25, 512  ;;  %p4384_p5 = scmp.lt.s32.totalorder %s4676_s25, %s4676_s25 }
  0x45   : > { %p4377_p3 = scmp.ne.s32.totalorder %s4676_s25, %s4376_s21  ;;  %p4385_p10 = scmp.lt.s32.totalorder %s4376_s21, %s4376_s21 }
  0x47   : > { %p4379_p8 = pnand %p4377_p3, %p4337_p9  ;;  %p4386_p2 = por %p4385_p10, %p4384_p5 }
  0x49   : > { %p4380_p4 = pneg %p4379_p8 }
  0x4b   : > { %p4387_p0 = pnand %p4386_p2, %p4380_p4 }
  0x4d   : > { %4390 = shalt.err (!%p4387_p0)
}
  0x4e   : > { %s4533_s11 = smov 64   ;;  %s4534_s18 = smov 4  }
  0x4f   : > { %4026 = dma.hbm_to_vmem [thread:$0]  (!%p4666_p7), %s5444_s4, 512, %s4676_s25, [#allocation9], %s4533_s11, %s4533_s11, %s4534_s18  }
  0x50   : > { %s3445_s12 = sshll.u32 %s4701_s14, 4  ;;  %s3603_s13 = sshll.u32 %s4529_s30, 8 }
  0x51   : > { %s4733_s24 = scalar_lea.hbm %s5440_s0, %s3603_s13  ;;  %s290_s21 = scalar_lea.vmem [#allocation2], %s3445_s12 }
  0x52   : > { %s297_s2 = sshll.u32 %s290_s21, 4  ;;  %s307_s22 = sand.u32 1, %s4529_s30   ;;  %s4735_s2 = int_to_ptr.vmem [resolvable:$true] %s297_s2 }
  0x53   : > { %s287_s29 = scalar_lea.sflag [#allocation3], %s4701_s14  ;;  %s4391_s27 = scalar_lea.hbm %s4733_s24, 256 }
  0x54   : > { %p4392_p9 = scmp.ne.s32.totalorder %s4733_s24, %s4391_s27  ;;  %p5474_p7 = scmp.ne.s32.totalorder %s5472_s23, 0 }
  0x55   : > { %s4396_s18 = scalar_lea.hbm %s5440_s0, 512  ;;  %p4397_p13 = scmp.lt.u32.totalorder %s4733_s24, %s5440_s0 }
  0x56   : > { %p4393_p6 = pneg %p5474_p7  ;;  %p4398_p1 = scmp.lt.u32.totalorder %s4396_s18, %s4391_s27 }
  0x57   : > { %p4400_p8 = scmp.lt.u32.totalorder %s4391_s27, %s4733_s24 }
  0x58   : > { %p4394_p11 = pnand %p4393_p6, %p4392_p9  ;;  %p4399_p3 = por %p4398_p1, %p4397_p13 }
  0x5a   : > { %p4395_p12 = pneg %p4394_p11  ;;  %p4401_p4 = por %p4400_p8, %p4399_p3 }
  0x5c   : > { %p4402_p5 = pnand %p4401_p4, %p4395_p12 }
  0x5e   : > { %4405 = shalt.err (!%p4402_p5)
}
  0x5f   : > { %s4406_s12 = scalar_lea.vmem %s4735_s2, 256  ;;  %s4535_s13 = smov [#allocation2]  }
  0x60   : > { %p4407_p10 = scmp.ne.s32.totalorder %s4735_s2, %s4406_s12  ;;  %s4411_s20 = sshll.u32 %s4535_s13, 4  ;;  %s4412_s20 = int_to_ptr.vmem [resolvable:$false] %s4411_s20 }
  0x61   : > { %s4413_s15 = scalar_lea.vmem %s4412_s20, 512  ;;  %p4414_p9 = scmp.lt.s32.totalorder %s4735_s2, %s4412_s20 }
  0x62   : > { %p4409_p2 = pnand %p4407_p10, %p4393_p6  ;;  %p4415_p11 = scmp.lt.s32.totalorder %s4413_s15, %s4406_s12 }
  0x64   : > { %p4410_p0 = pneg %p4409_p2  ;;  %p4416_p13 = por %p4415_p11, %p4414_p9 }
  0x66   : > { %p4417_p1 = pnand %p4416_p13, %p4410_p0 }
  0x68   : > { %4420 = shalt.err (!%p4417_p1)
}
  0x69   : > { %s4536_s27 = smov 128   ;;  %s4537_s21 = smov 8  }
  0x6a   : > { %4030 = dma.hbm_to_vmem [thread:$0]  (!%p5474_p7), %s4733_s24, 256, %s4735_s2, %s287_s29, %s4536_s27, %s4536_s27, %s4537_s21  }
  0x6b   : > { %s3448_s25 = sshll.u32 %s4701_s14, 1  ;;  %s3604_s11 = sshll.u32 %s4529_s30, 5 }
  0x6c   : > { %s4771_s10 = scalar_lea.hbm %s5441_s1, %s3604_s11  ;;  %s311_s12 = scalar_lea.vmem [#allocation5], %s3448_s25 }
  0x6d   : > { %s318_s13 = sshll.u32 %s311_s12, 4  ;;  %s4777_s20 = scalar_lea.sflag [#allocation6], %s307_s22  ;;  %s4773_s13 = int_to_ptr.vmem [resolvable:$true] %s318_s13 }
  0x6e   : > { %s4421_s15 = scalar_lea.hbm %s4771_s10, 32  ;;  %s4426_s14 = scalar_lea.hbm %s5441_s1, 64 }
  0x6f   : > { %p4422_p12 = scmp.ne.s32.totalorder %s4771_s10, %s4421_s15  ;;  %p4427_p4 = scmp.lt.u32.totalorder %s4771_s10, %s5441_s1 }
  0x70   : > { %p4428_p5 = scmp.lt.u32.totalorder %s4426_s14, %s4421_s15  ;;  %p4430_p2 = scmp.lt.u32.totalorder %s4421_s15, %s4771_s10 }
  0x71   : > { %p4424_p3 = pnand %p4422_p12, %p4393_p6 }
  0x72   : > { %p4429_p10 = por %p4428_p5, %p4427_p4 }
  0x73   : > { %p4425_p8 = pneg %p4424_p3 }
  0x74   : > { %p4431_p0 = por %p4430_p2, %p4429_p10 }
  0x76   : > { %p4432_p9 = pnand %p4431_p0, %p4425_p8 }
  0x78   : > { %4435 = shalt.err (!%p4432_p9)
}
  0x79   : > { %s4436_s22 = scalar_lea.vmem %s4773_s13, 32  ;;  %s4538_s21 = smov [#allocation5]  }
  0x7a   : > { %p4437_p11 = scmp.ne.s32.totalorder %s4773_s13, %s4436_s22  ;;  %s4441_s25 = sshll.u32 %s4538_s21, 4  ;;  %s4442_s25 = int_to_ptr.vmem [resolvable:$false] %s4441_s25 }
  0x7b   : > { %s4443_s11 = scalar_lea.vmem %s4442_s25, 64  ;;  %p4444_p12 = scmp.lt.s32.totalorder %s4773_s13, %s4442_s25 }
  0x7c   : > { %p4439_p13 = pnand %p4437_p11, %p4393_p6  ;;  %p4445_p3 = scmp.lt.s32.totalorder %s4443_s11, %s4436_s22 }
  0x7e   : > { %p4440_p1 = pneg %p4439_p13  ;;  %p4446_p4 = por %p4445_p3, %p4444_p12 }
  0x80   : > { %p4447_p5 = pnand %p4446_p4, %p4440_p1 }
  0x82   : > { %4450 = shalt.err (!%p4447_p5)
}
  0x83   : > { %s4539_s18 = smov 16   ;;  %s4540_s26 = smov 1  }
  0x84   : > { %4033 = dma.hbm_to_vmem [thread:$0]  (!%p5474_p7), %s4771_s10, 32, %s4773_s13, %s4777_s20, %s4539_s18, %s4539_s18, %s4540_s26  }
  0x85   : > { %p5475_p6 = scmp.ne.s32.totalorder %s5469_s19, 0 }
  0x86   : > { %s4806_s12 = sand.u32 (!%p5475_p6), 1, %s4521_s28   ;;  %p5476_p8 = scmp.ne.s32.totalorder (!%p5475_p6), %s5465_s16, 0 }
  0x87   : > { %330 = sbr.rel (%p5475_p6) target bundleno = 5375 (0x14ff), region = 52  ;;  %s3452_s15 = sshll.u32 (!%p5475_p6), %s4806_s12, 4 }
  0x88   : > { %s333_s2 = scalar_lea.sflag (!%p5475_p6), [#allocation3], %s4806_s12  ;;  %s336_s29 = scalar_lea.vmem (!%p5475_p6), [#allocation2], %s3452_s15 }
  0x8e   : > { %4496 = dma.done.wait (%p5476_p8), %s333_s2, 256  }
  0x8f   : > { %4498 = vsyncadd (%p5476_p8), %s333_s2, 4294967040  ;;  %s341_s19 = sand.u32 1, %s4617_s9   ;;  %s3453_s23 = sshll.u32 %s4806_s12, 1 }
  0x90   : > { %s342_s10 = scalar_lea.sflag [#allocation6], %s341_s19  ;;  %s4818_s13 = scalar_lea.vmem [#allocation5], %s3453_s23 }
  0x91   : > { %4500 = dma.done.wait (%p5476_p8), %s342_s10, 32  }
  0x92   : > { %4502 = vsyncadd (%p5476_p8), %s342_s10, 4294967264  ;;  %p5477_p7 = scmp.eq.s32.totalorder %s4617_s9, 0 }
  0x94   : > { %4504 = dma.done.wait (%p5477_p7), [#allocation6], 32   ;;  %p5478_p10 = pmov %p5477_p7 }
  0x95   : > { %p5479_p2 = pmov %p5477_p7 }
  0x96   : > { %4506 = vsyncadd (%p5478_p10), [#allocation6], 4294967264 }
  0x97   : > { %4508 = dma.done.wait (%p5479_p2), [#allocation9], 512   ;;  %p5480_p0 = pmov %p5479_p2 }
  0x98   : > { %vm399_vm0 = vcmask 261120   ;;  %v395_v0 = vld [vmem:[%s336_s29] sm:$0xff]  ;;  %v396_v1 = vld [vmem:[%s336_s29 + $0x8] sm:$0xff]  ;;  %v4541_v16 = vmov 0.0   ;;  %vm4542_vm1 = vmmov 0   ;;  %s4543_s14 = smov 120  }
  0x99   : > { %4510 = vsyncadd (%p5480_p0), [#allocation9], 4294966784  ;;  %v400_v2 = vsel %vm399_vm0, %v395_v0, 0.0  ;;  %v403_v3 = vsel %vm399_vm0, %v396_v1, 0.0  ;;  %v4213_v14 = vld [vmem:[%s5443_s3] sm:$0xff]   ;;  %3710 = vmatprep.subr.bf16.mxu1 %v4541_v16  ;;  %3726 = vmatprep.subr.bf16.mxu0 %v4541_v16  ;;  %v4215_v17 = vld [vmem:[%s5443_s3 + $0x8] sm:$0xff]  }
  0x9a   : > { %401 = vadd.xlane.f32.xlu0 %v400_v2  ;;  %v4214_v15 = vld [vmem:[%s5443_s3 + $0x20] sm:$0xff]   ;;  %3711 = vmatpush3.bf16.msra.mxu1 %v4213_v14  ;;  %v4216_v18 = vld [vmem:[%s5443_s3 + $0x28] sm:$0xff]   ;;  %v4217_v35 = vld [vmem:[%s5443_s3 + $0x10] sm:$0xff]   ;;  %vm721_vm2 = vcmask 64512   ;;  %s4544_s24 = smov 112   ;;  %s4545_s27 = smov 104  }
  0x9b   : > { %3727 = vmatpush3.bf16.msra.mxu0 %v4214_v15  ;;  %3712 = vmatprep.subr.bf16.mxu1 %v4541_v16  ;;  %v3457_v27 = vld [vmem:[#allocation7] ss:$0 sm:$0xff]  ;;  %v3458_v31 = vld [vmem:[#allocation7 + $0x1] ss:$0 sm:$0xff]  ;;  %v4218_v37 = vld [vmem:[%s5443_s3 + $0x18] sm:$0xff]   ;;  %vm1165_vm3 = vcmask 1043456  }
  0x9c   : > { %3728 = vmatprep.subr.bf16.mxu0 %v4541_v16  ;;  %3714 = vmatprep.mubr.msk.bf16.mxu1 %vm4542_vm1, %v4541_v16  ;;  %v3461_v38 = vld [vmem:[%s5446_s6] ss:$0 sm:$0xff]  ;;  %v3477_v41 = vld [vmem:[%s5446_s6 + $0x2] ss:$0 sm:$0xff]  ;;  %v3469_v53 = vld [vmem:[%s5446_s6 + $0x1] ss:$0 sm:$0xff] }
  0x9d   : > { %3730 = vmatprep.mubr.msk.bf16.mxu0 %vm4542_vm1, %v4541_v16  ;;  %s4546_s25 = smov 8   ;;  %s4547_s11 = smov 16   ;;  %vm1557_vm4 = vcmask 130048   ;;  %vm1560_vm5 = vcmask 195584   ;;  %vm1794_vm6 = vcmask 523264   ;;  %vm3308_vm7 = vcmask 253952  }
  0x9e   : > { %404 = vadd.xlane.f32.xlu0 %v403_v3  ;;  %3713 = vmatpush3.bf16.msra.mxu1 %v4215_v17  ;;  %s4548_s15 = smov 24   ;;  %s3605_s16 = sshll.u32 %s4617_s9, 5 }
  0x9f   : > { %3729 = vmatpush3.bf16.msra.mxu0 %v4216_v18  ;;  %3718 = vmatprep.subr.bf16.mxu1 %v4541_v16  ;;  %s390_s20 = scalar_lea.vmem [#allocation10], %s3453_s23  ;;  %s5392_s26 = scalar_lea.hbm %s5448_s8, %s3605_s16 }
  0xa0   : > { %3740 = vmatprep.subr.bf16.mxu0 %v4541_v16  ;;  %s3325_s22 = sshll.u32 %s390_s20, 4  ;;  %s3312_s9 = scalar_lea.sflag [#allocation4], %s4806_s12  ;;  %s5394_s22 = int_to_ptr.vmem [resolvable:$true] %s3325_s22 }
  0xa1   : > { %p5481_p11 = scmp.ne.s32.totalorder %s5466_s17, 0  ;;  %s4549_s23 = smov [#allocation10]  }
 0x127   : > { %v402_v4 = vpop.xlane.xlu0 %401 }
 0x128   : > { %v407_v5 = vmul.f32 0.03125, %v402_v4 }
 0x12a   : > { %v409_v6 = vsub.f32 %v395_v0, %v407_v5 }
 0x12b   : > { %v405_v7 = vpop.xlane.xlu0 %404 }
 0x12c   : > { %v408_v8 = vmul.f32 0.03125, %v405_v7  ;;  %v411_v9 = vmul.f32 %v409_v6, %v409_v6 }
 0x12e   : > { %v410_v10 = vsub.f32 %v396_v1, %v408_v8  ;;  %v413_v11 = vsel %vm399_vm0, %v411_v9, 0.0 }
 0x12f   : > { %414 = vadd.xlane.f32.xlu1 %v413_v11 }
 0x130   : > { %v412_v12 = vmul.f32 %v410_v10, %v410_v10 }
 0x132   : > { %v416_v13 = vsel %vm399_vm0, %v412_v12, 0.0 }
 0x133   : > { %417 = vadd.xlane.f32.xlu1 %v416_v13 }
 0x1bc   : > { %v415_v19 = vpop.xlane.xlu1 %414 }
 0x1bd   : > { %v419_v20 = vmul.f32 0.03125, %v415_v19 }
 0x1bf   : > { %v421_v21 = vadd.f32 1e-12, %v419_v20 }
 0x1c0   : > { %v418_v22 = vpop.xlane.xlu1 %417 }
 0x1c1   : > { %4241 = vrsqrt.f32 %v421_v21  ;;  %v420_v23 = vmul.f32 0.03125, %v418_v22 }
 0x1c3   : > { %v422_v24 = vadd.f32 1e-12, %v420_v23 }
 0x1c5   : > { %4243 = vrsqrt.f32 %v422_v24 }
 0x1cb   : > { %v4242_v25 = vpop.eup %4241 }
 0x1cc   : > { %v425_v26 = vmul.f32 %v4242_v25, %v409_v6 }
 0x1ce   : > { %v431_v30 = vmul.f32 %v3457_v27, %v425_v26 }
 0x1cf   : > { %v4244_v28 = vpop.eup %4243 }
 0x1d0   : > { %v426_v29 = vmul.f32 %v4244_v28, %v410_v10  ;;  %v4858_v33 = vadd.f32 %v3458_v31, %v431_v30 }
 0x1d2   : > { %v432_v32 = vmul.f32 %v3457_v27, %v426_v29 }
 0x1d4   : > { %v4860_v34 = vadd.f32 %v3458_v31, %v432_v32 }
 0x1d6   : > { %v453_v36 = vpack.c.bf16 %v4860_v34, %v4858_v33 }
 0x1d8   : > { %3715 = vmatmul.mubr.msk.bf16.vlgmr.msra.gmra.mrb[0].mxu1 %vm399_vm0, %v453_v36  ;;  %3731 = vmatmul.mubr.msk.bf16.vlgmr.msra.gmra.mrb[0].mxu0 %vm399_vm0, %v453_v36 }
 0x1d9   : > { %3719 = vmatpush3.bf16.msra.mxu1 %v4217_v35  ;;  %3722 = vmatprep.mubr.msk.bf16.mxu1 %vm4542_vm1, %v4541_v16 }
 0x1da   : > { %3720 = vmatprep.subr.bf16.mxu1 %v4541_v16  ;;  %3742 = vmatprep.mubr.msk.bf16.mxu0 %vm4542_vm1, %v4541_v16 }
 0x1dd   : > { %3721 = vmatpush3.bf16.msra.mxu1 %v4218_v37 }
 0x1de   : > { %3734 = vmatprep.subr.bf16.mxu1 %v4541_v16 }
 0x1e0   : > { %3723 = vmatmul.mubr.msk.bf16.vlgmr.msra.gmra.mrb[4].mxu1 %vm399_vm0, %v453_v36 }
 0x1e1   : > { %3736 = vmatprep.mubr.msk.bf16.mxu1 %vm4542_vm1, %v4541_v16 }
 0x2ab   : > { %v512_v39 = vpop.f32.mrb[0].mxu1  ;;  %v638_v40 = vpop.f32.mrb[0].mxu0 }
 0x2ac   : > { %v3716_v42 = vpop.f32.mrb[1].mxu1  ;;  %v3732_v43 = vpop.f32.mrb[1].mxu0  ;;  %v513_v46 = vadd.f32 %v3461_v38, %v512_v39  ;;  %v4889_v51 = vadd.f32 %v3477_v41, %v638_v40 }
 0x2ad   : > { %v515_v44 = vpop.f32.mrb[2].mxu1  ;;  %v641_v45 = vpop.f32.mrb[2].mxu0 }
 0x2ae   : > { %v516_v47 = vadd.f32 %v3461_v38, %v515_v44  ;;  %v4887_v48 = vadd.f32 %v3477_v41, %v641_v45  ;;  %v3717_v49 = vpop.f32.mrb[3].mxu1  ;;  %v3733_v50 = vpop.f32.mrb[3].mxu0  ;;  %v705_v2 = vpack.c.bf16 %v513_v46, %v513_v46  ;;  %v1154_v41 = vpack.c.bf16 %v4889_v51, %v4889_v51 }
 0x2af   : > { %v4954_v49 = vld [vmem:[%s4818_s13 + $0x1] ss:$0 sm:$0xff] }
 0x2b0   : > { %v4098_v52 = vpack.i.bf16 %v516_v47, %v513_v46  ;;  %v4896_v54 = vpack.i.bf16 %v4887_v48, %v4889_v51  ;;  %v706_v3 = vpack.c.bf16 %v516_v47, %v516_v47  ;;  %v1155_v42 = vpack.c.bf16 %v4887_v48, %v4887_v48  ;;  %v3459_v47 = vld [vmem:[%s4818_s13] ss:$0 sm:$0xff] }
 0x2b1   : > { %v1167_v45 = vsel %vm1165_vm3, %v1154_v41, 0 }
 0x2b2   : > { %4099 = vrot.lane.b32.xlu1 %v4098_v52, %s4543_s14  ;;  %v1213_v46 = vsel %vm1165_vm3, %v1155_v42, 0 }
 0x2b3   : > { %v575_v55 = vpop.f32.mrb[4].mxu1 }
 0x2b4   : > { %v576_v56 = vadd.f32 %v3469_v53, %v575_v55  ;;  %v3724_v57 = vpop.f32.mrb[5].mxu1 }
 0x2b5   : > { %v578_v58 = vpop.f32.mrb[6].mxu1 }
 0x2b6   : > { %v579_v59 = vadd.f32 %v3469_v53, %v578_v58  ;;  %v3725_v60 = vpop.f32.mrb[7].mxu1  ;;  %v713_v61 = vpack.c.bf16 %v576_v56, %v576_v56 }
 0x2b8   : > { %v726_v62 = vsel %vm721_vm2, %v713_v61, 0  ;;  %v4103_v63 = vpack.i.bf16 %v579_v59, %v576_v56  ;;  %v714_v0 = vpack.c.bf16 %v579_v59, %v579_v59 }
 0x2b9   : > { %3735 = vmatpush3.bf16.xpose.msra.mxu1 %v726_v62 }
 0x2ba   : > { %4104 = vrot.lane.b32.xlu1 %v4103_v63, %s4544_s24  ;;  %4094 = vrot.lane.b32.xlu0 %v4103_v63, %s4543_s14  ;;  %v772_v1 = vsel %vm721_vm2, %v714_v0, 0 }
 0x2bb   : > { %3741 = vmatpush3.bf16.xpose.msra.mxu0 %v772_v1  ;;  %3746 = vmatprep.subr.bf16.mxu1 %v4541_v16 }
 0x2bc   : > { %3752 = vmatprep.subr.bf16.mxu0 %v4541_v16 }
 0x2be   : > { %4109 = vrot.lane.b32.xlu1 %v4098_v52, %s4544_s24  ;;  %4114 = vrot.lane.b32.xlu0 %v4103_v63, %s4545_s27 }
 0x2c0   : > { %3737 = vmatmul.mubr.msk.bf16.vlgmr.msra.gmra.mrb[8].mxu1 %vm721_vm2, %v705_v2 }
 0x2c1   : > { %3748 = vmatprep.mubr.msk.bf16.mxu1 %vm4542_vm1, %v4541_v16 }
 0x2c2   : > { %4119 = vrot.lane.b32.xlu1 %v4098_v52, %s4545_s27  ;;  %3743 = vmatmul.mubr.msk.bf16.vlgmr.msra.gmra.mrb[4].mxu0 %vm721_vm2, %v706_v3 }
 0x2c3   : > { %3754 = vmatprep.mubr.msk.bf16.mxu0 %vm4542_vm1, %v4541_v16 }
 0x324   : > { %v4100_v4 = vpop.permute.xlu1 %4099 }
 0x325   : > { %v4101_v15 = vunpack.i.l.bf16 %v4100_v4  ;;  %v4102_v17 = vunpack.i.h.bf16 %v4100_v4 }
 0x327   : > { %v707_v21 = vpack.c.bf16 %v4101_v15, %v4101_v15  ;;  %v708_v22 = vpack.c.bf16 %v4102_v17, %v4102_v17 }
 0x32c   : > { %v4095_v5 = vpop.permute.xlu0 %4094  ;;  %v4105_v8 = vpop.permute.xlu1 %4104 }
 0x32d   : > { %v4097_v6 = vunpack.i.h.bf16 %v4095_v5  ;;  %v4096_v7 = vunpack.i.l.bf16 %v4095_v5  ;;  %v4106_v11 = vunpack.i.l.bf16 %v4105_v8  ;;  %v4107_v14 = vunpack.i.h.bf16 %v4105_v8 }
 0x32f   : > { %v716_v9 = vpack.c.bf16 %v4097_v6, %v4097_v6  ;;  %v715_v10 = vpack.c.bf16 %v4096_v7, %v4096_v7  ;;  %v717_v18 = vpack.c.bf16 %v4106_v11, %v4106_v11  ;;  %v718_v19 = vpack.c.bf16 %v4107_v14, %v4107_v14 }
 0x330   : > { %v4115_v20 = vpop.permute.xlu0 %4114  ;;  %v4110_v23 = vpop.permute.xlu1 %4109 }
 0x331   : > { %v818_v12 = vsel %vm721_vm2, %v715_v10, 0  ;;  %v864_v13 = vsel %vm721_vm2, %v716_v9, 0  ;;  %v4116_v24 = vunpack.i.l.bf16 %v4115_v20  ;;  %v910_v25 = vsel %vm721_vm2, %v717_v18, 0 }
 0x332   : > { %3747 = vmatpush3.bf16.xpose.msra.mxu1 %v818_v12  ;;  %3753 = vmatpush3.bf16.xpose.msra.mxu0 %v864_v13  ;;  %v4117_v26 = vunpack.i.h.bf16 %v4115_v20  ;;  %v956_v27 = vsel %vm721_vm2, %v718_v19, 0  ;;  %v4111_v28 = vunpack.i.l.bf16 %v4110_v23  ;;  %v4112_v29 = vunpack.i.h.bf16 %v4110_v23 }
 0x333   : > { %3758 = vmatprep.subr.bf16.mxu1 %v4541_v16  ;;  %3764 = vmatprep.subr.bf16.mxu0 %v4541_v16  ;;  %v719_v30 = vpack.c.bf16 %v4116_v24, %v4116_v24 }
 0x334   : > { %v720_v31 = vpack.c.bf16 %v4117_v26, %v4117_v26  ;;  %v709_v32 = vpack.c.bf16 %v4111_v28, %v4111_v28  ;;  %v710_v35 = vpack.c.bf16 %v4112_v29, %v4112_v29  ;;  %v4120_v36 = vpop.permute.xlu1 %4119 }
 0x335   : > { %v1002_v37 = vsel %vm721_vm2, %v719_v30, 0  ;;  %v4121_v39 = vunpack.i.l.bf16 %v4120_v36  ;;  %v4122_v40 = vunpack.i.h.bf16 %v4120_v36 }
 0x336   : > { %v1048_v38 = vsel %vm721_vm2, %v720_v31, 0 }
 0x337   : > { %v711_v43 = vpack.c.bf16 %v4121_v39, %v4121_v39  ;;  %v712_v44 = vpack.c.bf16 %v4122_v40, %v4122_v40 }
 0x339   : > { %3749 = vmatmul.mubr.msk.bf16.vlgmr.msra.gmra.mrb[12].mxu1 %vm721_vm2, %v707_v21  ;;  %3755 = vmatmul.mubr.msk.bf16.vlgmr.msra.gmra.mrb[8].mxu0 %vm721_vm2, %v708_v22 }
 0x33a   : > { %3759 = vmatpush3.bf16.xpose.msra.mxu1 %v910_v25  ;;  %3765 = vmatpush3.bf16.xpose.msra.mxu0 %v956_v27 }
 0x33b   : > { %3760 = vmatprep.mubr.msk.bf16.mxu1 %vm4542_vm1, %v4541_v16  ;;  %3766 = vmatprep.mubr.msk.bf16.mxu0 %vm4542_vm1, %v4541_v16 }
 0x33c   : > { %3770 = vmatprep.subr.bf16.mxu1 %v4541_v16  ;;  %3776 = vmatprep.subr.bf16.mxu0 %v4541_v16 }
 0x341   : > { %3761 = vmatmul.mubr.msk.bf16.vlgmr.msra.gmra.mrb[16].mxu1 %vm721_vm2, %v709_v32  ;;  %3767 = vmatmul.mubr.msk.bf16.vlgmr.msra.gmra.mrb[12].mxu0 %vm721_vm2, %v710_v35 }
 0x342   : > { %3771 = vmatpush3.bf16.xpose.msra.mxu1 %v1002_v37  ;;  %3777 = vmatpush3.bf16.xpose.msra.mxu0 %v1048_v38 }
 0x343   : > { %3772 = vmatprep.mubr.msk.bf16.mxu1 %vm4542_vm1, %v4541_v16  ;;  %3778 = vmatprep.mubr.msk.bf16.mxu0 %vm4542_vm1, %v4541_v16 }
 0x344   : > { %3782 = vmatprep.subr.bf16.mxu1 %v4541_v16  ;;  %3788 = vmatprep.subr.bf16.mxu0 %v4541_v16 }
 0x349   : > { %3773 = vmatmul.mubr.msk.bf16.vlgmr.msra.gmra.mrb[20].mxu1 %vm721_vm2, %v711_v43  ;;  %3779 = vmatmul.mubr.msk.bf16.vlgmr.msra.gmra.mrb[16].mxu0 %vm721_vm2, %v712_v44 }
 0x34a   : > { %3783 = vmatpush3.bf16.msra.mxu1 %v1167_v45  ;;  %3789 = vmatpush3.bf16.msra.mxu0 %v1213_v46 }
 0x34b   : > { %3784 = vmatprep.mubr.msk.bf16.mxu1 %vm4542_vm1, %v4541_v16  ;;  %3790 = vmatprep.mubr.msk.bf16.mxu0 %vm4542_vm1, %v4541_v16 }
 0x34c   : > { %3794 = vmatprep.subr.bf16.mxu1 %v4541_v16  ;;  %3800 = vmatprep.subr.bf16.mxu0 %v4541_v16 }
 0x393   : > { %v762_v48 = vpop.f32.mrb[8].mxu1 }
 0x394   : > { %v763_v50 = vadd.f32 %v3459_v47, %v762_v48  ;;  %v3738_v51 = vpop.f32.mrb[9].mxu1 }
 0x395   : > { %v765_v52 = vpop.f32.mrb[10].mxu1  ;;  %v808_v53 = vpop.f32.mrb[4].mxu0 }
 0x396   : > { %v1090_v55 = vmul.f32 1.442695, %v763_v50  ;;  %v809_v56 = vadd.f32 %v4954_v49, %v808_v53  ;;  %v3739_v57 = vpop.f32.mrb[11].mxu1  ;;  %v3744_v58 = vpop.f32.mrb[5].mxu0 }
 0x397   : > { %v811_v59 = vpop.f32.mrb[6].mxu0 }
 0x398   : > { %4245 = vpow2.f32 %v1090_v55  ;;  %v1092_v60 = vmul.f32 1.442695, %v809_v56  ;;  %v3745_v61 = vpop.f32.mrb[7].mxu0 }
 0x39a   : > { %4247 = vpow2.f32 %v1092_v60 }
 0x3a2   : > { %v4957_v62 = vpop.eup %4245 }
 0x3a3   : > { %v1106_v63 = vsel %vm721_vm2, %v4957_v62, 0.0 }
 0x3a4   : > { %v4961_v0 = vpop.eup %4247  ;;  %1107 = vadd.xlane.f32.xlu0 %v1106_v63 }
 0x3a5   : > { %v1109_v1 = vsel %vm721_vm2, %v4961_v0, 0.0 }
 0x3a6   : > { %1110 = vadd.xlane.f32.xlu1 %v1109_v1 }
 0x40c   : > { %v854_v2 = vpop.f32.mrb[12].mxu1  ;;  %v900_v4 = vpop.f32.mrb[8].mxu0 }
 0x40d   : > { %v855_v3 = vadd.f32 %v3459_v47, %v854_v2  ;;  %v3750_v5 = vpop.f32.mrb[13].mxu1  ;;  %v901_v6 = vadd.f32 %v4954_v49, %v900_v4  ;;  %v3756_v7 = vpop.f32.mrb[9].mxu0 }
 0x40e   : > { %v857_v8 = vpop.f32.mrb[14].mxu1  ;;  %v903_v10 = vpop.f32.mrb[10].mxu0 }
 0x40f   : > { %v1094_v9 = vmul.f32 1.442695, %v855_v3  ;;  %v3751_v11 = vpop.f32.mrb[15].mxu1  ;;  %v1096_v12 = vmul.f32 1.442695, %v901_v6  ;;  %v3757_v13 = vpop.f32.mrb[11].mxu0 }
 0x411   : > { %4249 = vpow2.f32 %v1094_v9 }
 0x412   : > { %4251 = vpow2.f32 %v1096_v12 }
 0x414   : > { %v946_v14 = vpop.f32.mrb[16].mxu1  ;;  %v992_v17 = vpop.f32.mrb[12].mxu0 }
 0x415   : > { %v947_v15 = vadd.f32 %v3459_v47, %v946_v14  ;;  %v3762_v18 = vpop.f32.mrb[17].mxu1  ;;  %v993_v19 = vadd.f32 %v4954_v49, %v992_v17  ;;  %v3768_v20 = vpop.f32.mrb[13].mxu0 }
 0x416   : > { %v949_v21 = vpop.f32.mrb[18].mxu1  ;;  %v995_v23 = vpop.f32.mrb[14].mxu0 }
 0x417   : > { %v1098_v22 = vmul.f32 1.442695, %v947_v15  ;;  %v3763_v24 = vpop.f32.mrb[19].mxu1  ;;  %v1100_v25 = vmul.f32 1.442695, %v993_v19  ;;  %v3769_v26 = vpop.f32.mrb[15].mxu0 }
 0x419   : > { %4253 = vpow2.f32 %v1098_v22 }
 0x41a   : > { %4255 = vpow2.f32 %v1100_v25 }
 0x41b   : > { %v4967_v27 = vpop.eup %4249 }
 0x41c   : > { %v1038_v28 = vpop.f32.mrb[20].mxu1  ;;  %v1112_v29 = vsel %vm721_vm2, %v4967_v27, 0.0  ;;  %v4971_v30 = vpop.eup %4251 }
 0x41d   : > { %v1039_v31 = vadd.f32 %v3459_v47, %v1038_v28  ;;  %v1084_v32 = vpop.f32.mrb[16].mxu0  ;;  %1113 = vadd.xlane.f32.xlu0 %v1112_v29  ;;  %v3774_v35 = vpop.f32.mrb[21].mxu1  ;;  %v1115_v42 = vsel %vm721_vm2, %v4971_v30, 0.0 }
 0x41e   : > { %v3780_v36 = vpop.f32.mrb[17].mxu0  ;;  %v1041_v37 = vpop.f32.mrb[22].mxu1  ;;  %v1085_v59 = vadd.f32 %v4954_v49, %v1084_v32 }
 0x41f   : > { %v1102_v38 = vmul.f32 1.442695, %v1039_v31  ;;  %v1087_v39 = vpop.f32.mrb[18].mxu0  ;;  %v3775_v40 = vpop.f32.mrb[23].mxu1 }
 0x420   : > { %v3781_v41 = vpop.f32.mrb[19].mxu0  ;;  %v1104_v60 = vmul.f32 1.442695, %v1085_v59 }
 0x421   : > { %4257 = vpow2.f32 %v1102_v38  ;;  %1116 = vadd.xlane.f32.xlu0 %v1115_v42 }
 0x423   : > { %v4975_v43 = vpop.eup %4253 }
 0x424   : > { %v4977_v44 = vpop.eup %4255  ;;  %v1118_v45 = vsel %vm721_vm2, %v4975_v43, 0.0 }
 0x425   : > { %v1121_v46 = vsel %vm721_vm2, %v4977_v44, 0.0  ;;  %1119 = vadd.xlane.f32.xlu0 %v1118_v45 }
 0x426   : > { %1122 = vadd.xlane.f32.xlu1 %v1121_v46 }
 0x42b   : > { %v4983_v47 = vpop.eup %4257 }
 0x42c   : > { %v1124_v48 = vsel %vm721_vm2, %v4983_v47, 0.0 }
 0x42d   : > { %1125 = vadd.xlane.f32.xlu0 %v1124_v48 }
 0x431   : > { %v1108_v50 = vpop.xlane.xlu0 %1107 }
 0x432   : > { %4259 = vrcp.f32 %v1108_v50 }
 0x433   : > { %v1111_v51 = vpop.xlane.xlu1 %1110 }
 0x434   : > { %4261 = vrcp.f32 %v1111_v51 }
 0x435   : > { %4263 = vpow2.f32 %v1104_v60 }
 0x437   : > { %4129 = vrot.lane.b32.xlu1 %v4896_v54, %s4544_s24 }
 0x43c   : > { %v4260_v52 = vpop.eup %4259 }
 0x43d   : > { %v1138_v53 = vmul.f32 %v4260_v52, %v4957_v62 }
 0x43e   : > { %v4262_v55 = vpop.eup %4261 }
 0x43f   : > { %v1139_v56 = vmul.f32 %v4262_v55, %v4961_v0  ;;  %v1146_v57 = vpack.c.bf16 %v1138_v53, %v1138_v53  ;;  %v5000_v61 = vpop.eup %4263 }
 0x440   : > { %v1127_v62 = vsel %vm721_vm2, %v5000_v61, 0.0 }
 0x441   : > { %3785 = vmatmul.mubr.msk.bf16.vlgmr.msra.gmra.mrb[24].mxu1 %vm721_vm2, %v1146_v57  ;;  %v1147_v58 = vpack.c.bf16 %v1139_v56, %v1139_v56  ;;  %v4219_v57 = vld [vmem:[%s5443_s3 + $0x30] sm:$0xff]  }
 0x442   : > { %3796 = vmatprep.mubr.msk.bf16.mxu1 %vm4542_vm1, %v4541_v16 }
 0x443   : > { %3791 = vmatmul.mubr.msk.bf16.vlgmr.msra.gmra.mrb[20].mxu0 %vm721_vm2, %v1147_v58  ;;  %4124 = vrot.lane.b32.xlu0 %v4896_v54, %s4543_s14 }
 0x444   : > { %3802 = vmatprep.mubr.msk.bf16.mxu0 %vm4542_vm1, %v4541_v16 }
 0x45b   : > { %1128 = vadd.xlane.f32.xlu1 %v1127_v62 }
 0x46c   : > { %4134 = vrot.lane.b32.xlu1 %v4896_v54, %s4545_s27 }
 0x4aa   : > { %v1114_v63 = vpop.xlane.xlu0 %1113 }
 0x4ab   : > { %4265 = vrcp.f32 %v1114_v63 }
 0x4ae   : > { %v1117_v0 = vpop.xlane.xlu0 %1116 }
 0x4af   : > { %4267 = vrcp.f32 %v1117_v0 }
 0x4b2   : > { %v1120_v2 = vpop.xlane.xlu0 %1119 }
 0x4b3   : > { %v1123_v1 = vpop.xlane.xlu1 %1122  ;;  %4269 = vrcp.f32 %v1120_v2 }
 0x4b4   : > { %4271 = vrcp.f32 %v1123_v1 }
 0x4b5   : > { %v4266_v4 = vpop.eup %4265 }
 0x4b6   : > { %v1140_v11 = vmul.f32 %v4266_v4, %v4967_v27 }
 0x4b7   : > { %v4130_v49 = vpop.permute.xlu1 %4129 }
 0x4b8   : > { %v4132_v7 = vunpack.i.h.bf16 %v4130_v49  ;;  %v4131_v8 = vunpack.i.l.bf16 %v4130_v49  ;;  %v1148_v20 = vpack.c.bf16 %v1140_v11, %v1140_v11 }
 0x4b9   : > { %v4268_v5 = vpop.eup %4267 }
 0x4ba   : > { %v1126_v3 = vpop.xlane.xlu0 %1125  ;;  %v1141_v54 = vmul.f32 %v4268_v5, %v4971_v30  ;;  %v1159_v14 = vpack.c.bf16 %v4132_v7, %v4132_v7  ;;  %v1158_v15 = vpack.c.bf16 %v4131_v8, %v4131_v8 }
 0x4bb   : > { %4273 = vrcp.f32 %v1126_v3 }
 0x4bc   : > { %v1149_v21 = vpack.c.bf16 %v1141_v54, %v1141_v54  ;;  %v1351_v23 = vsel %vm1165_vm3, %v1158_v15, 0  ;;  %v1397_v24 = vsel %vm1165_vm3, %v1159_v14, 0 }
 0x4bd   : > { %v4270_v19 = vpop.eup %4269 }
 0x4be   : > { %v4125_v6 = vpop.permute.xlu0 %4124  ;;  %v4272_v22 = vpop.eup %4271  ;;  %v1142_v26 = vmul.f32 %v4270_v19, %v4975_v43 }
 0x4bf   : > { %v4127_v9 = vunpack.i.h.bf16 %v4125_v6  ;;  %v4126_v10 = vunpack.i.l.bf16 %v4125_v6  ;;  %v1143_v25 = vmul.f32 %v4272_v22, %v4977_v44 }
 0x4c0   : > { %v1150_v27 = vpack.c.bf16 %v1142_v26, %v1142_v26 }
 0x4c1   : > { %v1157_v12 = vpack.c.bf16 %v4127_v9, %v4127_v9  ;;  %v1156_v13 = vpack.c.bf16 %v4126_v10, %v4126_v10  ;;  %v1151_v28 = vpack.c.bf16 %v1143_v25, %v1143_v25  ;;  %v4220_v9 = vld [vmem:[%s5443_s3 + $0x38] sm:$0xff]  }
 0x4c3   : > { %v1259_v17 = vsel %vm1165_vm3, %v1156_v13, 0  ;;  %v1305_v18 = vsel %vm1165_vm3, %v1157_v12, 0 }
 0x4c4   : > { %3795 = vmatpush3.bf16.msra.mxu1 %v1259_v17  ;;  %3801 = vmatpush3.bf16.msra.mxu0 %v1305_v18 }
 0x4c5   : > { %3806 = vmatprep.subr.bf16.mxu1 %v4541_v16  ;;  %3812 = vmatprep.subr.bf16.mxu0 %v4541_v16  ;;  %v4274_v30 = vpop.eup %4273 }
 0x4c6   : > { %v1144_v36 = vmul.f32 %v4274_v30, %v4983_v47 }
 0x4c7   : > { %3797 = vmatmul.mubr.msk.bf16.vlgmr.msra.gmra.mrb[28].mxu1 %vm721_vm2, %v1148_v20  ;;  %3803 = vmatmul.mubr.msk.bf16.vlgmr.msra.gmra.mrb[24].mxu0 %vm721_vm2, %v1149_v21 }
 0x4c8   : > { %3807 = vmatpush3.bf16.msra.mxu1 %v1351_v23  ;;  %3813 = vmatpush3.bf16.msra.mxu0 %v1397_v24  ;;  %v1152_v42 = vpack.c.bf16 %v1144_v36, %v1144_v36 }
 0x4c9   : > { %3808 = vmatprep.mubr.msk.bf16.mxu1 %vm4542_vm1, %v4541_v16  ;;  %3814 = vmatprep.mubr.msk.bf16.mxu0 %vm4542_vm1, %v4541_v16 }
 0x4ca   : > { %3818 = vmatprep.subr.bf16.mxu1 %v4541_v16  ;;  %3824 = vmatprep.subr.bf16.mxu0 %v4541_v16 }
 0x4cf   : > { %3809 = vmatmul.mubr.msk.bf16.vlgmr.msra.gmra.mrb[32].mxu1 %vm721_vm2, %v1150_v27  ;;  %3815 = vmatmul.mubr.msk.bf16.vlgmr.msra.gmra.mrb[28].mxu0 %vm721_vm2, %v1151_v28 }
 0x4d0   : > { %3820 = vmatprep.mubr.msk.bf16.mxu1 %vm4542_vm1, %v4541_v16  ;;  %3826 = vmatprep.mubr.msk.bf16.mxu0 %vm4542_vm1, %v4541_v16 }
 0x4e8   : > { %v1129_v29 = vpop.xlane.xlu1 %1128 }
 0x4e9   : > { %4275 = vrcp.f32 %v1129_v29 }
 0x4ec   : > { %v4135_v31 = vpop.permute.xlu1 %4134 }
 0x4ed   : > { %v4137_v32 = vunpack.i.h.bf16 %v4135_v31  ;;  %v4136_v35 = vunpack.i.l.bf16 %v4135_v31 }
 0x4ef   : > { %v1161_v37 = vpack.c.bf16 %v4137_v32, %v4137_v32  ;;  %v1160_v38 = vpack.c.bf16 %v4136_v35, %v4136_v35 }
 0x4f1   : > { %v1443_v39 = vsel %vm1165_vm3, %v1160_v38, 0  ;;  %v1489_v40 = vsel %vm1165_vm3, %v1161_v37, 0  ;;  %v3501_v37 = vld [vmem:[%s5446_s6 + $0x3] ss:$0 sm:$0xff] }
 0x4f2   : > { %3819 = vmatpush3.bf16.msra.mxu1 %v1443_v39  ;;  %3825 = vmatpush3.bf16.msra.mxu0 %v1489_v40 }
 0x4f3   : > { %v4276_v41 = vpop.eup %4275  ;;  %3830 = vmatprep.subr.bf16.mxu1 %v4541_v16  ;;  %3838 = vmatprep.subr.bf16.mxu0 %v4541_v16 }
 0x4f4   : > { %v1145_v43 = vmul.f32 %v4276_v41, %v5000_v61 }
 0x4f5   : > { %3821 = vmatmul.mubr.msk.bf16.vlgmr.msra.gmra.mrb[36].mxu1 %vm721_vm2, %v1152_v42 }
 0x4f6   : > { %v1153_v44 = vpack.c.bf16 %v1145_v43, %v1145_v43  ;;  %3834 = vmatprep.mubr.msk.bf16.mxu1 %vm4542_vm1, %v4541_v16  ;;  %3831 = vmatpush3.bf16.msra.mxu1 %v4219_v57 }
 0x4f7   : > { %3832 = vmatprep.subr.bf16.mxu1 %v4541_v16 }
 0x4f8   : > { %3827 = vmatmul.mubr.msk.bf16.vlgmr.msra.gmra.mrb[32].mxu0 %vm721_vm2, %v1153_v44 }
 0x4f9   : > { %3842 = vmatprep.mubr.msk.bf16.mxu0 %vm4542_vm1, %v4541_v16 }
 0x4fa   : > { %3833 = vmatpush3.bf16.msra.mxu1 %v4220_v9 }
 0x4fb   : > { %3846 = vmatprep.subr.bf16.mxu1 %v4541_v16 }
 0x514   : > { %v1203_v45 = vpop.f32.mrb[24].mxu1 }
 0x515   : > { %v3786_v46 = vpop.f32.mrb[25].mxu1 }
 0x516   : > { %v1206_v47 = vpop.f32.mrb[26].mxu1  ;;  %v1249_v48 = vpop.f32.mrb[20].mxu0 }
 0x517   : > { %v3787_v50 = vpop.f32.mrb[27].mxu1  ;;  %v3792_v51 = vpop.f32.mrb[21].mxu0 }
 0x518   : > { %v1252_v52 = vpop.f32.mrb[22].mxu0 }
 0x519   : > { %v3793_v53 = vpop.f32.mrb[23].mxu0 }
 0x59a   : > { %v1295_v55 = vpop.f32.mrb[28].mxu1  ;;  %v1341_v56 = vpop.f32.mrb[24].mxu0 }
 0x59b   : > { %v4138_v58 = vpack.i.bf16 %v1341_v56, %v1295_v55  ;;  %v3798_v59 = vpop.f32.mrb[29].mxu1  ;;  %v3804_v60 = vpop.f32.mrb[25].mxu0 }
 0x59c   : > { %v1298_v61 = vpop.f32.mrb[30].mxu1  ;;  %v1344_v62 = vpop.f32.mrb[26].mxu0  ;;  %v4221_v59 = vld [vmem:[#allocation8] sm:$0xff]  }
 0x59d   : > { %v3805_v63 = vpop.f32.mrb[27].mxu0  ;;  %4139 = vrot.lane.b32.xlu1 %v4138_v58, %s4546_s25  ;;  %v3799_v0 = vpop.f32.mrb[31].mxu1  ;;  %3839 = vmatpush3.bf16.msra.mxu0 %v4221_v59 }
 0x59e   : > { %3840 = vmatprep.subr.bf16.mxu0 %v4541_v16 }
 0x5a2   : > { %v1387_v1 = vpop.f32.mrb[32].mxu1  ;;  %v1433_v2 = vpop.f32.mrb[28].mxu0 }
 0x5a3   : > { %v4143_v3 = vpack.i.bf16 %v1433_v2, %v1387_v1  ;;  %v3810_v49 = vpop.f32.mrb[33].mxu1  ;;  %v3816_v4 = vpop.f32.mrb[29].mxu0 }
 0x5a4   : > { %v1390_v5 = vpop.f32.mrb[34].mxu1  ;;  %v1436_v6 = vpop.f32.mrb[30].mxu0  ;;  %v3505_v49 = vld [vmem:[%s5446_s6 + $0x4] ss:$0 sm:$0xff] }
 0x5a5   : > { %v3817_v7 = vpop.f32.mrb[31].mxu0  ;;  %4144 = vrot.lane.b32.xlu0 %v4143_v3, %s4547_s11  ;;  %v3811_v8 = vpop.f32.mrb[35].mxu1 }
 0x5a6   : > { %v3506_v7 = vld [vmem:[%s5446_s6 + $0x5] ss:$0 sm:$0xff] }
 0x5c8   : > { %v1479_v10 = vpop.f32.mrb[36].mxu1 }
 0x5c9   : > { %v3822_v11 = vpop.f32.mrb[37].mxu1 }
 0x5ca   : > { %v1482_v54 = vpop.f32.mrb[38].mxu1 }
 0x5cb   : > { %v3823_v12 = vpop.f32.mrb[39].mxu1  ;;  %v1525_v13 = vpop.f32.mrb[32].mxu0  ;;  %v4223_v54 = vld [vmem:[%s5445_s5] sm:$0xff]  }
 0x5cc   : > { %v4148_v14 = vpack.i.bf16 %v1525_v13, %v1479_v10  ;;  %v3828_v15 = vpop.f32.mrb[33].mxu0  ;;  %v4224_v12 = vld [vmem:[%s5445_s5 + $0x8] sm:$0xff]   ;;  %v4225_v13 = vld [vmem:[%s5445_s5 + $0x10] sm:$0xff]  }
 0x5cd   : > { %v1528_v17 = vpop.f32.mrb[34].mxu0  ;;  %v3507_v15 = vld [vmem:[%s5447_s7] ss:$0 sm:$0xff] }
 0x5ce   : > { %v3829_v18 = vpop.f32.mrb[35].mxu0  ;;  %4149 = vrot.lane.b32.xlu1 %v4148_v14, %s4548_s15  ;;  %v4226_v14 = vld [vmem:[%s5445_s5 + $0x18] sm:$0xff]  }
 0x60f   : > { %v4140_v19 = vpop.permute.xlu1 %4139 }
 0x610   : > { %v4142_v21 = vunpack.i.h.bf16 %v4140_v19  ;;  %v4141_v22 = vunpack.i.l.bf16 %v4140_v19 }
 0x612   : > { %v1556_v26 = vsel %vm721_vm2, %v1249_v48, %v4142_v21  ;;  %v1555_v27 = vsel %vm721_vm2, %v1203_v45, %v4141_v22 }
 0x617   : > { %v4145_v20 = vpop.permute.xlu0 %4144 }
 0x618   : > { %v4147_v23 = vunpack.i.h.bf16 %v4145_v20  ;;  %v4146_v24 = vunpack.i.l.bf16 %v4145_v20 }
 0x61a   : > { %v1559_v30 = vsel %vm1557_vm4, %v1556_v26, %v4147_v23  ;;  %v1558_v31 = vsel %vm1557_vm4, %v1555_v27, %v4146_v24 }
 0x640   : > { %v4150_v25 = vpop.permute.xlu1 %4149 }
 0x641   : > { %v4152_v28 = vunpack.i.h.bf16 %v4150_v25  ;;  %v4151_v29 = vunpack.i.l.bf16 %v4150_v25 }
 0x643   : > { %v1562_v32 = vsel %vm1560_vm5, %v1559_v30, %v4152_v28  ;;  %v1561_v35 = vsel %vm1560_vm5, %v1558_v31, %v4151_v29 }
 0x644   : > { %v1563_v36 = vpack.c.bf16 %v1562_v32, %v1561_v35 }
 0x646   : > { %3835 = vmatmul.mubr.msk.bf16.vlgmr.msra.gmra.mrb[40].mxu1 %vm399_vm0, %v1563_v36 }
 0x647   : > { %3854 = vmatprep.mubr.msk.bf16.mxu1 %vm4542_vm1, %v4541_v16  ;;  %3847 = vmatpush3.bf16.msra.mxu1 %v4223_v54 }
 0x648   : > { %3848 = vmatprep.subr.bf16.mxu1 %v4541_v16 }
 0x64b   : > { %3849 = vmatpush3.bf16.msra.mxu1 %v4224_v12 }
 0x64c   : > { %3850 = vmatprep.subr.bf16.mxu1 %v4541_v16 }
 0x64f   : > { %3851 = vmatpush3.bf16.msra.mxu1 %v4225_v13 }
 0x650   : > { %3852 = vmatprep.subr.bf16.mxu1 %v4541_v16 }
 0x653   : > { %3853 = vmatpush3.bf16.msra.mxu1 %v4226_v14 }
 0x654   : > { %3874 = vmatprep.subr.bf16.mxu1 %v4541_v16 }
 0x719   : > { %v1623_v38 = vpop.f32.mrb[40].mxu1 }
 0x71a   : > { %v1624_v39 = vadd.f32 %v3501_v37, %v1623_v38  ;;  %v3836_v40 = vpop.f32.mrb[41].mxu1 }
 0x71b   : > { %v1626_v41 = vpop.f32.mrb[42].mxu1 }
 0x71c   : > { %v1627_v42 = vadd.f32 %v3501_v37, %v1626_v41  ;;  %v3837_v43 = vpop.f32.mrb[43].mxu1  ;;  %v1630_v44 = vadd.f32 %v1624_v39, %v4858_v33 }
 0x71e   : > { %v1634_v45 = vsel %vm399_vm0, %v1630_v44, 0.0  ;;  %v1631_v46 = vadd.f32 %v1627_v42, %v4860_v34  ;;  %v4222_v34 = vld [vmem:[#allocation8 + $0x8] sm:$0xff]  }
 0x71f   : > { %1635 = vadd.xlane.f32.xlu0 %v1634_v45  ;;  %3841 = vmatpush3.bf16.msra.mxu0 %v4222_v34 }
 0x720   : > { %v1637_v47 = vsel %vm399_vm0, %v1631_v46, 0.0  ;;  %3858 = vmatprep.subr.bf16.mxu0 %v4541_v16 }
 0x721   : > { %1638 = vadd.xlane.f32.xlu1 %v1637_v47 }
 0x7ac   : > { %v1636_v48 = vpop.xlane.xlu0 %1635 }
 0x7ad   : > { %v1640_v50 = vmul.f32 0.03125, %v1636_v48 }
 0x7ae   : > { %v1639_v51 = vpop.xlane.xlu1 %1638 }
 0x7af   : > { %v1642_v52 = vsub.f32 %v1630_v44, %v1640_v50  ;;  %v1641_v53 = vmul.f32 0.03125, %v1639_v51  ;;  %v3511_v44 = vld [vmem:[%s5446_s6 + $0x6] ss:$0 sm:$0xff] }
 0x7b1   : > { %v1643_v55 = vsub.f32 %v1631_v46, %v1641_v53  ;;  %v1644_v56 = vmul.f32 %v1642_v52, %v1642_v52 }
 0x7b3   : > { %v1646_v57 = vsel %vm399_vm0, %v1644_v56, 0.0  ;;  %v1645_v58 = vmul.f32 %v1643_v55, %v1643_v55 }
 0x7b4   : > { %1647 = vadd.xlane.f32.xlu0 %v1646_v57 }
 0x7b5   : > { %v1649_v33 = vsel %vm399_vm0, %v1645_v58, 0.0 }
 0x7b8   : > { %1650 = vadd.xlane.f32.xlu0 %v1649_v33 }
 0x841   : > { %v1648_v60 = vpop.xlane.xlu0 %1647 }
 0x842   : > { %v1652_v61 = vmul.f32 0.03125, %v1648_v60 }
 0x844   : > { %v1654_v62 = vadd.f32 1e-12, %v1652_v61 }
 0x845   : > { %v1651_v63 = vpop.xlane.xlu0 %1650 }
 0x846   : > { %4277 = vrsqrt.f32 %v1654_v62  ;;  %v1653_v0 = vmul.f32 0.03125, %v1651_v63 }
 0x848   : > { %v1655_v1 = vadd.f32 1e-12, %v1653_v0 }
 0x84a   : > { %4279 = vrsqrt.f32 %v1655_v1  ;;  %v4227_v1 = vld [vmem:[%s5443_s3 + $0x40] sm:$0xff]  }
 0x850   : > { %v4278_v2 = vpop.eup %4277 }
 0x851   : > { %v1658_v3 = vmul.f32 %v4278_v2, %v1642_v52  ;;  %v4228_v2 = vld [vmem:[%s5443_s3 + $0x60] sm:$0xff]  }
 0x853   : > { %v1664_v5 = vmul.f32 %v3505_v49, %v1658_v3  ;;  %v4229_v3 = vld [vmem:[%s5443_s3 + $0x48] sm:$0xff]  }
 0x854   : > { %v4280_v4 = vpop.eup %4279 }
 0x855   : > { %v1659_v6 = vmul.f32 %v4280_v4, %v1643_v55  ;;  %v1670_v9 = vadd.f32 %v3506_v7, %v1664_v5 }
 0x857   : > { %v1665_v8 = vmul.f32 %v3505_v49, %v1659_v6  ;;  %v4230_v49 = vld [vmem:[%s5443_s3 + $0x68] sm:$0xff]  }
 0x859   : > { %v1671_v10 = vadd.f32 %v3506_v7, %v1665_v8 }
 0x85b   : > { %v1672_v11 = vpack.c.bf16 %v1671_v10, %v1670_v9 }
 0x85d   : > { %3843 = vmatmul.mubr.msk.bf16.vlgmr.msra.gmra.mrb[36].mxu0 %vm399_vm0, %v1672_v11  ;;  %v3517_v11 = vld [vmem:[%s5446_s6 + $0x7] ss:$0 sm:$0xff] }
 0x85e   : > { %3862 = vmatprep.mubr.msk.bf16.mxu0 %vm4542_vm1, %v4541_v16  ;;  %3859 = vmatpush3.bf16.msra.mxu0 %v4227_v1 }
 0x85f   : > { %3860 = vmatprep.subr.bf16.mxu0 %v4541_v16 }
 0x862   : > { %3861 = vmatpush3.bf16.msra.mxu0 %v4229_v3 }
 0x863   : > { %3866 = vmatprep.subr.bf16.mxu0 %v4541_v16 }
 0x930   : > { %v1731_v17 = vpop.f32.mrb[36].mxu0 }
 0x931   : > { %v1732_v18 = vadd.f32 %v3507_v15, %v1731_v17  ;;  %v3844_v19 = vpop.f32.mrb[37].mxu0 }
 0x932   : > { %v1734_v20 = vpop.f32.mrb[38].mxu0 }
 0x933   : > { %v1740_v21 = vmul.f32 0.044715, %v1732_v18  ;;  %v1735_v22 = vadd.f32 %v3507_v15, %v1734_v20  ;;  %v3845_v23 = vpop.f32.mrb[39].mxu0  ;;  %v1738_v38 = vmul.f32 0.5, %v1732_v18  ;;  %v3518_v15 = vld [vmem:[%s5446_s6 + $0x8] ss:$0 sm:$0xff] }
 0x934   : > { %v4231_v20 = vld [vmem:[%s5443_s3 + $0x50] sm:$0xff]  }
 0x935   : > { %v1742_v24 = vmul.f32 %v1740_v21, %v1732_v18  ;;  %v1741_v25 = vmul.f32 0.044715, %v1735_v22  ;;  %v1739_v39 = vmul.f32 0.5, %v1735_v22  ;;  %v3524_v23 = vld [vmem:[%s5446_s6 + $0x10] ss:$0 sm:$0xff] }
 0x937   : > { %v1744_v26 = vmul.f32 %v1742_v24, %v1732_v18  ;;  %v1743_v27 = vmul.f32 %v1741_v25, %v1735_v22 }
 0x939   : > { %v1746_v28 = vadd.f32 %v1744_v26, %v1732_v18  ;;  %v1745_v29 = vmul.f32 %v1743_v27, %v1735_v22  ;;  %v3542_v26 = vld [vmem:[%s5446_s6 + $0x12] ss:$0 sm:$0xff] }
 0x93b   : > { %v1748_v30 = vmul.f32 0.7978846, %v1746_v28  ;;  %v1747_v31 = vadd.f32 %v1745_v29, %v1735_v22  ;;  %v4232_v22 = vld [vmem:[%s5443_s3 + $0x58] sm:$0xff]  }
 0x93d   : > { %4281 = vtanh.f32 %v1748_v30  ;;  %v1749_v32 = vmul.f32 0.7978846, %v1747_v31 }
 0x93f   : > { %4283 = vtanh.f32 %v1749_v32 }
 0x947   : > { %v4282_v35 = vpop.eup %4281 }
 0x948   : > { %v1752_v36 = vadd.f32 1.0, %v4282_v35 }
 0x949   : > { %v4284_v37 = vpop.eup %4283 }
 0x94a   : > { %v1753_v40 = vadd.f32 1.0, %v4284_v37  ;;  %v1754_v41 = vmul.f32 %v1752_v36, %v1738_v38 }
 0x94c   : > { %v1755_v42 = vmul.f32 %v1753_v40, %v1739_v39  ;;  %v3533_v40 = vld [vmem:[%s5446_s6 + $0x11] ss:$0 sm:$0xff] }
 0x94e   : > { %v1756_v43 = vpack.c.bf16 %v1755_v42, %v1754_v41 }
 0x950   : > { %3855 = vmatmul.mubr.msk.bf16.vlgmr.msra.gmra.mrb[44].mxu1 %vm1794_vm6, %v1756_v43 }
 0x951   : > { %3878 = vmatprep.mubr.msk.bf16.mxu1 %vm4542_vm1, %v4541_v16  ;;  %3875 = vmatpush3.bf16.msra.mxu1 %v4228_v2 }
 0x952   : > { %3876 = vmatprep.subr.bf16.mxu1 %v4541_v16 }
 0x955   : > { %3877 = vmatpush3.bf16.msra.mxu1 %v4230_v49 }
 0x956   : > { %3888 = vmatprep.subr.bf16.mxu1 %v4541_v16 }
 0xa23   : > { %v1832_v45 = vpop.f32.mrb[44].mxu1 }
 0xa24   : > { %v1833_v46 = vadd.f32 %v3511_v44, %v1832_v45  ;;  %v3856_v47 = vpop.f32.mrb[45].mxu1 }
 0xa25   : > { %v1835_v48 = vpop.f32.mrb[46].mxu1 }
 0xa26   : > { %v1836_v50 = vadd.f32 %v3511_v44, %v1835_v48  ;;  %v3857_v51 = vpop.f32.mrb[47].mxu1  ;;  %v1839_v52 = vadd.f32 %v1833_v46, %v1670_v9 }
 0xa28   : > { %v1843_v53 = vsel %vm399_vm0, %v1839_v52, 0.0  ;;  %v1840_v55 = vadd.f32 %v1836_v50, %v1671_v10 }
 0xa29   : > { %1844 = vadd.xlane.f32.xlu0 %v1843_v53 }
 0xa2a   : > { %v1846_v56 = vsel %vm399_vm0, %v1840_v55, 0.0 }
 0xa2b   : > { %1847 = vadd.xlane.f32.xlu1 %v1846_v56 }
 0xab6   : > { %v1845_v57 = vpop.xlane.xlu0 %1844 }
 0xab7   : > { %v1849_v58 = vmul.f32 0.03125, %v1845_v57 }
 0xab8   : > { %v1848_v33 = vpop.xlane.xlu1 %1847 }
 0xab9   : > { %v1851_v59 = vsub.f32 %v1839_v52, %v1849_v58  ;;  %v1850_v34 = vmul.f32 0.03125, %v1848_v33 }
 0xabb   : > { %v1852_v60 = vsub.f32 %v1840_v55, %v1850_v34  ;;  %v1853_v61 = vmul.f32 %v1851_v59, %v1851_v59 }
 0xabd   : > { %v1855_v62 = vsel %vm399_vm0, %v1853_v61, 0.0  ;;  %v1854_v63 = vmul.f32 %v1852_v60, %v1852_v60 }
 0xabe   : > { %1856 = vadd.xlane.f32.xlu0 %v1855_v62 }
 0xabf   : > { %v1858_v0 = vsel %vm399_vm0, %v1854_v63, 0.0 }
 0xac0   : > { %1859 = vadd.xlane.f32.xlu1 %v1858_v0 }
 0xb4b   : > { %v1857_v4 = vpop.xlane.xlu0 %1856 }
 0xb4c   : > { %v1861_v5 = vmul.f32 0.03125, %v1857_v4 }
 0xb4d   : > { %v1860_v6 = vpop.xlane.xlu1 %1859 }
 0xb4e   : > { %v1863_v7 = vadd.f32 1e-12, %v1861_v5  ;;  %v1862_v8 = vmul.f32 0.03125, %v1860_v6 }
 0xb50   : > { %4285 = vrsqrt.f32 %v1863_v7  ;;  %v1864_v9 = vadd.f32 1e-12, %v1862_v8 }
 0xb52   : > { %4287 = vrsqrt.f32 %v1864_v9 }
 0xb5a   : > { %v4286_v10 = vpop.eup %4285 }
 0xb5b   : > { %v1867_v54 = vmul.f32 %v4286_v10, %v1851_v59 }
 0xb5c   : > { %v4288_v12 = vpop.eup %4287 }
 0xb5d   : > { %v1873_v13 = vmul.f32 %v3517_v11, %v1867_v54  ;;  %v1868_v14 = vmul.f32 %v4288_v12, %v1852_v60 }
 0xb5f   : > { %v1874_v17 = vmul.f32 %v3517_v11, %v1868_v14  ;;  %v5133_v18 = vadd.f32 %v3518_v15, %v1873_v13 }
 0xb61   : > { %v5135_v19 = vadd.f32 %v3518_v15, %v1874_v17 }
 0xb63   : > { %v1881_v21 = vpack.c.bf16 %v5135_v19, %v5133_v18 }
 0xb65   : > { %3863 = vmatmul.mubr.msk.bf16.vlgmr.msra.gmra.mrb[40].mxu0 %vm399_vm0, %v1881_v21  ;;  %3879 = vmatmul.mubr.msk.bf16.vlgmr.msra.gmra.mrb[48].mxu1 %vm399_vm0, %v1881_v21 }
 0xb66   : > { %3867 = vmatpush3.bf16.msra.mxu0 %v4231_v20  ;;  %3870 = vmatprep.mubr.msk.bf16.mxu0 %vm4542_vm1, %v4541_v16 }
 0xb67   : > { %3868 = vmatprep.subr.bf16.mxu0 %v4541_v16  ;;  %3890 = vmatprep.mubr.msk.bf16.mxu1 %vm4542_vm1, %v4541_v16 }
 0xb6a   : > { %3869 = vmatpush3.bf16.msra.mxu0 %v4232_v22 }
 0xb6b   : > { %3882 = vmatprep.subr.bf16.mxu0 %v4541_v16 }
 0xb6d   : > { %3871 = vmatmul.mubr.msk.bf16.vlgmr.msra.gmra.mrb[44].mxu0 %vm399_vm0, %v1881_v21 }
 0xb6e   : > { %3884 = vmatprep.mubr.msk.bf16.mxu0 %vm4542_vm1, %v4541_v16 }
 0xc38   : > { %v1942_v24 = vpop.f32.mrb[40].mxu0  ;;  %v2068_v25 = vpop.f32.mrb[48].mxu1 }
 0xc39   : > { %v3864_v27 = vpop.f32.mrb[41].mxu0  ;;  %v3880_v28 = vpop.f32.mrb[49].mxu1  ;;  %v1943_v31 = vadd.f32 %v3524_v23, %v1942_v24  ;;  %v5164_v38 = vadd.f32 %v3542_v26, %v2068_v25 }
 0xc3a   : > { %v1945_v29 = vpop.f32.mrb[42].mxu0  ;;  %v2071_v30 = vpop.f32.mrb[50].mxu1 }
 0xc3b   : > { %v1946_v32 = vadd.f32 %v3524_v23, %v1945_v29  ;;  %v5162_v35 = vadd.f32 %v3542_v26, %v2071_v30  ;;  %v3865_v36 = vpop.f32.mrb[43].mxu0  ;;  %v3881_v37 = vpop.f32.mrb[51].mxu1  ;;  %v2135_v55 = vpack.c.bf16 %v1943_v31, %v1943_v31  ;;  %v2583_v26 = vpack.c.bf16 %v5164_v38, %v5164_v38 }
 0xc3d   : > { %v4158_v39 = vpack.i.bf16 %v1946_v32, %v1943_v31  ;;  %v5171_v41 = vpack.i.bf16 %v5162_v35, %v5164_v38  ;;  %v2136_v56 = vpack.c.bf16 %v1946_v32, %v1946_v32  ;;  %v2584_v27 = vpack.c.bf16 %v5162_v35, %v5162_v35  ;;  %v4333_v35 = vld [vmem:[%s4818_s13] ss:$0 sm:$0xff] }
 0xc3e   : > { %v2595_v30 = vsel %vm1165_vm3, %v2583_v26, 0 }
 0xc3f   : > { %4159 = vrot.lane.b32.xlu1 %v4158_v39, %s4543_s14  ;;  %v2641_v31 = vsel %vm1165_vm3, %v2584_v27, 0 }
 0xc40   : > { %v2005_v42 = vpop.f32.mrb[44].mxu0 }
 0xc41   : > { %v2006_v43 = vadd.f32 %v3533_v40, %v2005_v42  ;;  %v3872_v44 = vpop.f32.mrb[45].mxu0  ;;  %v5229_v42 = vld [vmem:[%s4818_s13 + $0x1] ss:$0 sm:$0xff]  ;;  %s4451_s13 = scalar_lea.vmem %s5394_s22, 32 }
 0xc42   : > { %v2008_v45 = vpop.f32.mrb[46].mxu0  ;;  %p4452_p9 = scmp.ne.s32.totalorder %s5394_s22, %s4451_s13 }
 0xc43   : > { %v2009_v46 = vadd.f32 %v3533_v40, %v2008_v45  ;;  %v3873_v47 = vpop.f32.mrb[47].mxu0  ;;  %v2143_v48 = vpack.c.bf16 %v2006_v43, %v2006_v43 }
 0xc44   : > { %p4453_p13 = pnand %p4452_p9, %p5481_p11 }
 0xc45   : > { %v2155_v50 = vsel %vm721_vm2, %v2143_v48, 0  ;;  %v4163_v51 = vpack.i.bf16 %v2009_v46, %v2006_v43  ;;  %v2144_v52 = vpack.c.bf16 %v2009_v46, %v2009_v46 }
 0xc46   : > { %3883 = vmatpush3.bf16.xpose.msra.mxu0 %v2155_v50  ;;  %p4454_p1 = pneg %p4453_p13 }
 0xc47   : > { %4164 = vrot.lane.b32.xlu1 %v4163_v51, %s4544_s24  ;;  %4154 = vrot.lane.b32.xlu0 %v4163_v51, %s4543_s14  ;;  %v2201_v53 = vsel %vm721_vm2, %v2144_v52, 0 }
 0xc48   : > { %3889 = vmatpush3.bf16.xpose.msra.mxu1 %v2201_v53  ;;  %3894 = vmatprep.subr.bf16.mxu0 %v4541_v16 }
 0xc49   : > { %3900 = vmatprep.subr.bf16.mxu1 %v4541_v16 }
 0xc4b   : > { %4169 = vrot.lane.b32.xlu1 %v4158_v39, %s4544_s24  ;;  %4174 = vrot.lane.b32.xlu0 %v4163_v51, %s4545_s27 }
 0xc4d   : > { %3885 = vmatmul.mubr.msk.bf16.vlgmr.msra.gmra.mrb[48].mxu0 %vm721_vm2, %v2135_v55 }
 0xc4e   : > { %3896 = vmatprep.mubr.msk.bf16.mxu0 %vm4542_vm1, %v4541_v16 }
 0xc4f   : > { %4179 = vrot.lane.b32.xlu1 %v4158_v39, %s4545_s27  ;;  %3891 = vmatmul.mubr.msk.bf16.vlgmr.msra.gmra.mrb[52].mxu1 %vm721_vm2, %v2136_v56 }
 0xc50   : > { %3902 = vmatprep.mubr.msk.bf16.mxu1 %vm4542_vm1, %v4541_v16 }
 0xcb1   : > { %v4160_v57 = vpop.permute.xlu1 %4159 }
 0xcb2   : > { %v4161_v2 = vunpack.i.l.bf16 %v4160_v57  ;;  %v4162_v3 = vunpack.i.h.bf16 %v4160_v57 }
 0xcb4   : > { %v2137_v6 = vpack.c.bf16 %v4161_v2, %v4161_v2  ;;  %v2138_v7 = vpack.c.bf16 %v4162_v3, %v4162_v3 }
 0xcb9   : > { %v4155_v58 = vpop.permute.xlu0 %4154  ;;  %v4165_v34 = vpop.permute.xlu1 %4164 }
 0xcba   : > { %v4157_v33 = vunpack.i.h.bf16 %v4155_v58  ;;  %v4156_v59 = vunpack.i.l.bf16 %v4155_v58  ;;  %v4166_v62 = vunpack.i.l.bf16 %v4165_v34  ;;  %v4167_v1 = vunpack.i.h.bf16 %v4165_v34 }
 0xcbc   : > { %v2146_v60 = vpack.c.bf16 %v4157_v33, %v4157_v33  ;;  %v2145_v61 = vpack.c.bf16 %v4156_v59, %v4156_v59  ;;  %v2147_v49 = vpack.c.bf16 %v4166_v62, %v4166_v62  ;;  %v2148_v4 = vpack.c.bf16 %v4167_v1, %v4167_v1 }
 0xcbd   : > { %v4175_v5 = vpop.permute.xlu0 %4174  ;;  %v4170_v8 = vpop.permute.xlu1 %4169 }
 0xcbe   : > { %v2247_v63 = vsel %vm721_vm2, %v2145_v61, 0  ;;  %v2293_v0 = vsel %vm721_vm2, %v2146_v60, 0  ;;  %v4176_v9 = vunpack.i.l.bf16 %v4175_v5  ;;  %v2339_v10 = vsel %vm721_vm2, %v2147_v49, 0 }
 0xcbf   : > { %3895 = vmatpush3.bf16.xpose.msra.mxu0 %v2247_v63  ;;  %3901 = vmatpush3.bf16.xpose.msra.mxu1 %v2293_v0  ;;  %v4177_v11 = vunpack.i.h.bf16 %v4175_v5  ;;  %v2385_v54 = vsel %vm721_vm2, %v2148_v4, 0  ;;  %v4171_v12 = vunpack.i.l.bf16 %v4170_v8  ;;  %v4172_v13 = vunpack.i.h.bf16 %v4170_v8 }
 0xcc0   : > { %3906 = vmatprep.subr.bf16.mxu0 %v4541_v16  ;;  %3912 = vmatprep.subr.bf16.mxu1 %v4541_v16  ;;  %v2149_v14 = vpack.c.bf16 %v4176_v9, %v4176_v9 }
 0xcc1   : > { %v2150_v15 = vpack.c.bf16 %v4177_v11, %v4177_v11  ;;  %v2139_v17 = vpack.c.bf16 %v4171_v12, %v4171_v12  ;;  %v2140_v20 = vpack.c.bf16 %v4172_v13, %v4172_v13  ;;  %v4180_v21 = vpop.permute.xlu1 %4179 }
 0xcc2   : > { %v2431_v22 = vsel %vm721_vm2, %v2149_v14, 0  ;;  %v4181_v24 = vunpack.i.l.bf16 %v4180_v21  ;;  %v4182_v25 = vunpack.i.h.bf16 %v4180_v21 }
 0xcc3   : > { %v2477_v23 = vsel %vm721_vm2, %v2150_v15, 0 }
 0xcc4   : > { %v2141_v28 = vpack.c.bf16 %v4181_v24, %v4181_v24  ;;  %v2142_v29 = vpack.c.bf16 %v4182_v25, %v4182_v25 }
 0xcc6   : > { %3897 = vmatmul.mubr.msk.bf16.vlgmr.msra.gmra.mrb[52].mxu0 %vm721_vm2, %v2137_v6  ;;  %3903 = vmatmul.mubr.msk.bf16.vlgmr.msra.gmra.mrb[56].mxu1 %vm721_vm2, %v2138_v7 }
 0xcc7   : > { %3907 = vmatpush3.bf16.xpose.msra.mxu0 %v2339_v10  ;;  %3913 = vmatpush3.bf16.xpose.msra.mxu1 %v2385_v54 }
 0xcc8   : > { %3908 = vmatprep.mubr.msk.bf16.mxu0 %vm4542_vm1, %v4541_v16  ;;  %3914 = vmatprep.mubr.msk.bf16.mxu1 %vm4542_vm1, %v4541_v16 }
 0xcc9   : > { %3918 = vmatprep.subr.bf16.mxu0 %v4541_v16  ;;  %3924 = vmatprep.subr.bf16.mxu1 %v4541_v16 }
 0xcce   : > { %3909 = vmatmul.mubr.msk.bf16.vlgmr.msra.gmra.mrb[56].mxu0 %vm721_vm2, %v2139_v17  ;;  %3915 = vmatmul.mubr.msk.bf16.vlgmr.msra.gmra.mrb[60].mxu1 %vm721_vm2, %v2140_v20 }
 0xccf   : > { %3919 = vmatpush3.bf16.xpose.msra.mxu0 %v2431_v22  ;;  %3925 = vmatpush3.bf16.xpose.msra.mxu1 %v2477_v23 }
 0xcd0   : > { %3920 = vmatprep.mubr.msk.bf16.mxu0 %vm4542_vm1, %v4541_v16  ;;  %3926 = vmatprep.mubr.msk.bf16.mxu1 %vm4542_vm1, %v4541_v16 }
 0xcd1   : > { %3930 = vmatprep.subr.bf16.mxu0 %v4541_v16  ;;  %3936 = vmatprep.subr.bf16.mxu1 %v4541_v16 }
 0xcd6   : > { %3921 = vmatmul.mubr.msk.bf16.vlgmr.msra.gmra.mrb[60].mxu0 %vm721_vm2, %v2141_v28  ;;  %3927 = vmatmul.mubr.msk.bf16.vlgmr.msra.gmra.mrb[64].mxu1 %vm721_vm2, %v2142_v29 }
 0xcd7   : > { %3931 = vmatpush3.bf16.msra.mxu0 %v2595_v30  ;;  %3937 = vmatpush3.bf16.msra.mxu1 %v2641_v31 }
 0xcd8   : > { %3932 = vmatprep.mubr.msk.bf16.mxu0 %vm4542_vm1, %v4541_v16  ;;  %3938 = vmatprep.mubr.msk.bf16.mxu1 %vm4542_vm1, %v4541_v16 }
 0xcd9   : > { %3942 = vmatprep.subr.bf16.mxu0 %v4541_v16  ;;  %3948 = vmatprep.subr.bf16.mxu1 %v4541_v16 }
 0xd20   : > { %v2191_v32 = vpop.f32.mrb[48].mxu0 }
 0xd21   : > { %v2192_v36 = vadd.f32 %v4333_v35, %v2191_v32  ;;  %v3886_v37 = vpop.f32.mrb[49].mxu0 }
 0xd22   : > { %v2194_v38 = vpop.f32.mrb[50].mxu0  ;;  %v2237_v39 = vpop.f32.mrb[52].mxu1 }
 0xd23   : > { %v2519_v40 = vmul.f32 1.442695, %v2192_v36  ;;  %v2238_v43 = vadd.f32 %v5229_v42, %v2237_v39  ;;  %v3887_v44 = vpop.f32.mrb[51].mxu0  ;;  %v3892_v45 = vpop.f32.mrb[53].mxu1 }
 0xd24   : > { %v2240_v46 = vpop.f32.mrb[54].mxu1 }
 0xd25   : > { %4289 = vpow2.f32 %v2519_v40  ;;  %v2521_v47 = vmul.f32 1.442695, %v2238_v43  ;;  %v3893_v48 = vpop.f32.mrb[55].mxu1 }
 0xd27   : > { %4291 = vpow2.f32 %v2521_v47 }
 0xd2f   : > { %v5232_v50 = vpop.eup %4289 }
 0xd30   : > { %v2535_v51 = vsel %vm721_vm2, %v5232_v50, 0.0 }
 0xd31   : > { %v5236_v52 = vpop.eup %4291  ;;  %2536 = vadd.xlane.f32.xlu0 %v2535_v51 }
 0xd32   : > { %v2538_v53 = vsel %vm721_vm2, %v5236_v52, 0.0 }
 0xd33   : > { %2539 = vadd.xlane.f32.xlu1 %v2538_v53 }
 0xd99   : > { %v2283_v55 = vpop.f32.mrb[52].mxu0  ;;  %v2329_v57 = vpop.f32.mrb[56].mxu1 }
 0xd9a   : > { %v2284_v56 = vadd.f32 %v4333_v35, %v2283_v55  ;;  %v3898_v58 = vpop.f32.mrb[53].mxu0  ;;  %v2330_v33 = vadd.f32 %v5229_v42, %v2329_v57  ;;  %v3904_v59 = vpop.f32.mrb[57].mxu1 }
 0xd9b   : > { %v2286_v34 = vpop.f32.mrb[54].mxu0  ;;  %v2332_v61 = vpop.f32.mrb[58].mxu1 }
 0xd9c   : > { %v2523_v60 = vmul.f32 1.442695, %v2284_v56  ;;  %v3899_v62 = vpop.f32.mrb[55].mxu0  ;;  %v2525_v63 = vmul.f32 1.442695, %v2330_v33  ;;  %v3905_v0 = vpop.f32.mrb[59].mxu1 }
 0xd9e   : > { %4293 = vpow2.f32 %v2523_v60 }
 0xd9f   : > { %4295 = vpow2.f32 %v2525_v63 }
 0xda1   : > { %v2375_v1 = vpop.f32.mrb[56].mxu0  ;;  %v2421_v3 = vpop.f32.mrb[60].mxu1 }
 0xda2   : > { %v2376_v2 = vadd.f32 %v4333_v35, %v2375_v1  ;;  %v3910_v49 = vpop.f32.mrb[57].mxu0  ;;  %v2422_v4 = vadd.f32 %v5229_v42, %v2421_v3  ;;  %v3916_v5 = vpop.f32.mrb[61].mxu1 }
 0xda3   : > { %v2378_v6 = vpop.f32.mrb[58].mxu0  ;;  %v2424_v8 = vpop.f32.mrb[62].mxu1 }
 0xda4   : > { %v2527_v7 = vmul.f32 1.442695, %v2376_v2  ;;  %v3911_v9 = vpop.f32.mrb[59].mxu0  ;;  %v2529_v10 = vmul.f32 1.442695, %v2422_v4  ;;  %v3917_v11 = vpop.f32.mrb[63].mxu1 }
 0xda6   : > { %4297 = vpow2.f32 %v2527_v7 }
 0xda7   : > { %4299 = vpow2.f32 %v2529_v10 }
 0xda8   : > { %v5242_v54 = vpop.eup %4293 }
 0xda9   : > { %v2467_v12 = vpop.f32.mrb[60].mxu0  ;;  %v2541_v13 = vsel %vm721_vm2, %v5242_v54, 0.0  ;;  %v5246_v14 = vpop.eup %4295 }
 0xdaa   : > { %v2468_v15 = vadd.f32 %v4333_v35, %v2467_v12  ;;  %v2513_v17 = vpop.f32.mrb[64].mxu1  ;;  %2542 = vadd.xlane.f32.xlu0 %v2541_v13  ;;  %v3922_v20 = vpop.f32.mrb[61].mxu0  ;;  %v2544_v27 = vsel %vm721_vm2, %v5246_v14, 0.0 }
 0xdab   : > { %v3928_v21 = vpop.f32.mrb[65].mxu1  ;;  %v2470_v22 = vpop.f32.mrb[62].mxu0  ;;  %v2514_v46 = vadd.f32 %v5229_v42, %v2513_v17 }
 0xdac   : > { %v2531_v23 = vmul.f32 1.442695, %v2468_v15  ;;  %v2516_v24 = vpop.f32.mrb[66].mxu1  ;;  %v3923_v25 = vpop.f32.mrb[63].mxu0 }
 0xdad   : > { %v3929_v26 = vpop.f32.mrb[67].mxu1  ;;  %v2533_v47 = vmul.f32 1.442695, %v2514_v46 }
 0xdae   : > { %4301 = vpow2.f32 %v2531_v23  ;;  %2545 = vadd.xlane.f32.xlu0 %v2544_v27 }
 0xdb0   : > { %v5250_v28 = vpop.eup %4297 }
 0xdb1   : > { %v5252_v29 = vpop.eup %4299  ;;  %v2547_v30 = vsel %vm721_vm2, %v5250_v28, 0.0 }
 0xdb2   : > { %2548 = vadd.xlane.f32.xlu0 %v2547_v30  ;;  %v2550_v31 = vsel %vm721_vm2, %v5252_v29, 0.0 }
 0xdb3   : > { %2551 = vadd.xlane.f32.xlu1 %v2550_v31 }
 0xdb8   : > { %v5258_v32 = vpop.eup %4301 }
 0xdb9   : > { %v2553_v35 = vsel %vm721_vm2, %v5258_v32, 0.0 }
 0xdba   : > { %2554 = vadd.xlane.f32.xlu0 %v2553_v35 }
 0xdbe   : > { %v2537_v36 = vpop.xlane.xlu0 %2536 }
 0xdbf   : > { %4303 = vrcp.f32 %v2537_v36 }
 0xdc0   : > { %v2540_v37 = vpop.xlane.xlu1 %2539 }
 0xdc1   : > { %4305 = vrcp.f32 %v2540_v37 }
 0xdc2   : > { %4307 = vpow2.f32 %v2533_v47 }
 0xdc4   : > { %4189 = vrot.lane.b32.xlu1 %v5171_v41, %s4544_s24 }
 0xdc9   : > { %v4304_v38 = vpop.eup %4303 }
 0xdca   : > { %v2567_v39 = vmul.f32 %v4304_v38, %v5232_v50 }
 0xdcb   : > { %v4306_v40 = vpop.eup %4305 }
 0xdcc   : > { %v2568_v43 = vmul.f32 %v4306_v40, %v5236_v52  ;;  %v2575_v44 = vpack.c.bf16 %v2567_v39, %v2567_v39  ;;  %v5275_v48 = vpop.eup %4307 }
 0xdcd   : > { %v2556_v50 = vsel %vm721_vm2, %v5275_v48, 0.0 }
 0xdce   : > { %3933 = vmatmul.mubr.msk.bf16.vlgmr.msra.gmra.mrb[64].mxu0 %vm721_vm2, %v2575_v44  ;;  %v2576_v45 = vpack.c.bf16 %v2568_v43, %v2568_v43  ;;  %v4233_v44 = vld [vmem:[%s5443_s3 + $0x70] sm:$0xff]  }
 0xdcf   : > { %3944 = vmatprep.mubr.msk.bf16.mxu0 %vm4542_vm1, %v4541_v16 }
 0xdd0   : > { %3939 = vmatmul.mubr.msk.bf16.vlgmr.msra.gmra.mrb[68].mxu1 %vm721_vm2, %v2576_v45  ;;  %4184 = vrot.lane.b32.xlu0 %v5171_v41, %s4543_s14  ;;  %s4455_s14 = sshll.u32 %s4549_s23, 4  ;;  %s4456_s14 = int_to_ptr.vmem [resolvable:$false] %s4455_s14 }
 0xdd1   : > { %3950 = vmatprep.mubr.msk.bf16.mxu1 %vm4542_vm1, %v4541_v16  ;;  %s4457_s24 = scalar_lea.vmem %s4456_s14, 64  ;;  %p4458_p12 = scmp.lt.s32.totalorder %s5394_s22, %s4456_s14 }
 0xdd2   : > { %p4459_p3 = scmp.lt.s32.totalorder %s4457_s24, %s4451_s13 }
 0xdd4   : > { %p4460_p4 = por %p4459_p3, %p4458_p12 }
 0xdd6   : > { %p4461_p5 = pnand %p4460_p4, %p4454_p1 }
 0xde8   : > { %2557 = vadd.xlane.f32.xlu1 %v2556_v50 }
 0xdf9   : > { %4194 = vrot.lane.b32.xlu1 %v5171_v41, %s4545_s27 }
 0xe37   : > { %v2543_v51 = vpop.xlane.xlu0 %2542 }
 0xe38   : > { %4309 = vrcp.f32 %v2543_v51 }
 0xe3b   : > { %v2546_v52 = vpop.xlane.xlu0 %2545 }
 0xe3c   : > { %4311 = vrcp.f32 %v2546_v52 }
 0xe3f   : > { %v2549_v53 = vpop.xlane.xlu0 %2548 }
 0xe40   : > { %v2552_v55 = vpop.xlane.xlu1 %2551  ;;  %4313 = vrcp.f32 %v2549_v53 }
 0xe41   : > { %4315 = vrcp.f32 %v2552_v55 }
 0xe42   : > { %v4310_v57 = vpop.eup %4309 }
 0xe43   : > { %v2569_v62 = vmul.f32 %v4310_v57, %v5242_v54 }
 0xe44   : > { %v4190_v42 = vpop.permute.xlu1 %4189 }
 0xe45   : > { %v4192_v59 = vunpack.i.h.bf16 %v4190_v42  ;;  %v4191_v34 = vunpack.i.l.bf16 %v4190_v42  ;;  %v2577_v5 = vpack.c.bf16 %v2569_v62, %v2569_v62 }
 0xe46   : > { %v4312_v58 = vpop.eup %4311 }
 0xe47   : > { %v2555_v56 = vpop.xlane.xlu0 %2554  ;;  %v2570_v41 = vmul.f32 %v4312_v58, %v5246_v14  ;;  %v2588_v1 = vpack.c.bf16 %v4192_v59, %v4192_v59  ;;  %v2587_v2 = vpack.c.bf16 %v4191_v34, %v4191_v34 }
 0xe48   : > { %4317 = vrcp.f32 %v2555_v56 }
 0xe49   : > { %v2578_v6 = vpack.c.bf16 %v2570_v41, %v2570_v41  ;;  %v2779_v8 = vsel %vm1165_vm3, %v2587_v2, 0  ;;  %v2825_v9 = vsel %vm1165_vm3, %v2588_v1, 0 }
 0xe4a   : > { %v4314_v4 = vpop.eup %4313 }
 0xe4b   : > { %v4185_v33 = vpop.permute.xlu0 %4184  ;;  %v4316_v7 = vpop.eup %4315  ;;  %v2571_v10 = vmul.f32 %v4314_v4, %v5250_v28 }
 0xe4c   : > { %v4187_v60 = vunpack.i.h.bf16 %v4185_v33  ;;  %v4186_v61 = vunpack.i.l.bf16 %v4185_v33  ;;  %v2572_v11 = vmul.f32 %v4316_v7, %v5252_v29 }
 0xe4d   : > { %v2579_v54 = vpack.c.bf16 %v2571_v10, %v2571_v10 }
 0xe4e   : > { %v2586_v63 = vpack.c.bf16 %v4187_v60, %v4187_v60  ;;  %v2585_v0 = vpack.c.bf16 %v4186_v61, %v4186_v61  ;;  %v2580_v12 = vpack.c.bf16 %v2572_v11, %v2572_v11  ;;  %v4234_v60 = vld [vmem:[%s5443_s3 + $0x78] sm:$0xff]  }
 0xe50   : > { %v2687_v3 = vsel %vm1165_vm3, %v2585_v0, 0  ;;  %v2733_v49 = vsel %vm1165_vm3, %v2586_v63, 0 }
 0xe51   : > { %3943 = vmatpush3.bf16.msra.mxu0 %v2687_v3  ;;  %3949 = vmatpush3.bf16.msra.mxu1 %v2733_v49 }
 0xe52   : > { %3954 = vmatprep.subr.bf16.mxu0 %v4541_v16  ;;  %3960 = vmatprep.subr.bf16.mxu1 %v4541_v16  ;;  %v4318_v14 = vpop.eup %4317 }
 0xe53   : > { %v2573_v21 = vmul.f32 %v4318_v14, %v5258_v32 }
 0xe54   : > { %3945 = vmatmul.mubr.msk.bf16.vlgmr.msra.gmra.mrb[68].mxu0 %vm721_vm2, %v2577_v5  ;;  %3951 = vmatmul.mubr.msk.bf16.vlgmr.msra.gmra.mrb[72].mxu1 %vm721_vm2, %v2578_v6 }
 0xe55   : > { %3955 = vmatpush3.bf16.msra.mxu0 %v2779_v8  ;;  %3961 = vmatpush3.bf16.msra.mxu1 %v2825_v9  ;;  %v2581_v27 = vpack.c.bf16 %v2573_v21, %v2573_v21 }
 0xe56   : > { %3956 = vmatprep.mubr.msk.bf16.mxu0 %vm4542_vm1, %v4541_v16  ;;  %3962 = vmatprep.mubr.msk.bf16.mxu1 %vm4542_vm1, %v4541_v16 }
 0xe57   : > { %3966 = vmatprep.subr.bf16.mxu0 %v4541_v16  ;;  %3972 = vmatprep.subr.bf16.mxu1 %v4541_v16 }
 0xe5c   : > { %3957 = vmatmul.mubr.msk.bf16.vlgmr.msra.gmra.mrb[72].mxu0 %vm721_vm2, %v2579_v54  ;;  %3963 = vmatmul.mubr.msk.bf16.vlgmr.msra.gmra.mrb[76].mxu1 %vm721_vm2, %v2580_v12 }
 0xe5d   : > { %3968 = vmatprep.mubr.msk.bf16.mxu0 %vm4542_vm1, %v4541_v16  ;;  %3974 = vmatprep.mubr.msk.bf16.mxu1 %vm4542_vm1, %v4541_v16 }
 0xe75   : > { %v2558_v13 = vpop.xlane.xlu1 %2557 }
 0xe76   : > { %4319 = vrcp.f32 %v2558_v13 }
 0xe79   : > { %v4195_v15 = vpop.permute.xlu1 %4194 }
 0xe7a   : > { %v4197_v17 = vunpack.i.h.bf16 %v4195_v15  ;;  %v4196_v20 = vunpack.i.l.bf16 %v4195_v15 }
 0xe7c   : > { %v2590_v22 = vpack.c.bf16 %v4197_v17, %v4197_v17  ;;  %v2589_v23 = vpack.c.bf16 %v4196_v20, %v4196_v20 }
 0xe7e   : > { %v2871_v24 = vsel %vm1165_vm3, %v2589_v23, 0  ;;  %v2917_v25 = vsel %vm1165_vm3, %v2590_v22, 0  ;;  %v3567_v22 = vld [vmem:[%s5446_s6 + $0x13] ss:$0 sm:$0xff] }
 0xe7f   : > { %3967 = vmatpush3.bf16.msra.mxu0 %v2871_v24  ;;  %3973 = vmatpush3.bf16.msra.mxu1 %v2917_v25 }
 0xe80   : > { %v4320_v26 = vpop.eup %4319  ;;  %3978 = vmatprep.subr.bf16.mxu0 %v4541_v16  ;;  %3986 = vmatprep.subr.bf16.mxu1 %v4541_v16 }
 0xe81   : > { %v2574_v28 = vmul.f32 %v4320_v26, %v5275_v48 }
 0xe82   : > { %3969 = vmatmul.mubr.msk.bf16.vlgmr.msra.gmra.mrb[76].mxu0 %vm721_vm2, %v2581_v27 }
 0xe83   : > { %v2582_v29 = vpack.c.bf16 %v2574_v28, %v2574_v28  ;;  %3982 = vmatprep.mubr.msk.bf16.mxu0 %vm4542_vm1, %v4541_v16  ;;  %3979 = vmatpush3.bf16.msra.mxu0 %v4233_v44 }
 0xe84   : > { %3980 = vmatprep.subr.bf16.mxu0 %v4541_v16 }
 0xe85   : > { %3975 = vmatmul.mubr.msk.bf16.vlgmr.msra.gmra.mrb[80].mxu1 %vm721_vm2, %v2582_v29 }
 0xe86   : > { %3990 = vmatprep.mubr.msk.bf16.mxu1 %vm4542_vm1, %v4541_v16 }
 0xe87   : > { %3981 = vmatpush3.bf16.msra.mxu0 %v4234_v60 }
 0xe88   : > { %3994 = vmatprep.subr.bf16.mxu0 %v4541_v16 }
 0xea1   : > { %v2631_v30 = vpop.f32.mrb[64].mxu0 }
 0xea2   : > { %v3934_v31 = vpop.f32.mrb[65].mxu0 }
 0xea3   : > { %v2634_v32 = vpop.f32.mrb[66].mxu0  ;;  %v2677_v35 = vpop.f32.mrb[68].mxu1 }
 0xea4   : > { %v3935_v36 = vpop.f32.mrb[67].mxu0  ;;  %v3940_v37 = vpop.f32.mrb[69].mxu1 }
 0xea5   : > { %v2680_v38 = vpop.f32.mrb[70].mxu1 }
 0xea6   : > { %v3941_v39 = vpop.f32.mrb[71].mxu1 }
 0xf27   : > { %v2723_v40 = vpop.f32.mrb[68].mxu0  ;;  %v2769_v43 = vpop.f32.mrb[72].mxu1 }
 0xf28   : > { %v4198_v45 = vpack.i.bf16 %v2769_v43, %v2723_v40  ;;  %v3946_v46 = vpop.f32.mrb[69].mxu0  ;;  %v3952_v47 = vpop.f32.mrb[73].mxu1 }
 0xf29   : > { %v2726_v48 = vpop.f32.mrb[70].mxu0  ;;  %v2772_v50 = vpop.f32.mrb[74].mxu1  ;;  %v4235_v46 = vld [vmem:[#allocation8 + $0x10] sm:$0xff]  }
 0xf2a   : > { %v3947_v51 = vpop.f32.mrb[71].mxu0  ;;  %4199 = vrot.lane.b32.xlu1 %v4198_v45, %s4546_s25  ;;  %v3953_v52 = vpop.f32.mrb[75].mxu1  ;;  %3987 = vmatpush3.bf16.msra.mxu1 %v4235_v46 }
 0xf2b   : > { %3988 = vmatprep.subr.bf16.mxu1 %v4541_v16 }
 0xf2f   : > { %v2815_v53 = vpop.f32.mrb[72].mxu0  ;;  %v2861_v55 = vpop.f32.mrb[76].mxu1 }
 0xf30   : > { %v4203_v56 = vpack.i.bf16 %v2861_v55, %v2815_v53  ;;  %v3958_v42 = vpop.f32.mrb[73].mxu0  ;;  %v3964_v57 = vpop.f32.mrb[77].mxu1 }
 0xf31   : > { %v2818_v58 = vpop.f32.mrb[74].mxu0  ;;  %v2864_v33 = vpop.f32.mrb[78].mxu1  ;;  %v3573_v42 = vld [vmem:[%s5446_s6 + $0x14] ss:$0 sm:$0xff] }
 0xf32   : > { %v3959_v59 = vpop.f32.mrb[75].mxu0  ;;  %4204 = vrot.lane.b32.xlu0 %v4203_v56, %s4547_s11  ;;  %v3965_v34 = vpop.f32.mrb[79].mxu1 }
 0xf33   : > { %v3574_v59 = vld [vmem:[%s5446_s6 + $0x15] ss:$0 sm:$0xff] }
 0xf55   : > { %v2907_v61 = vpop.f32.mrb[76].mxu0 }
 0xf56   : > { %v3970_v62 = vpop.f32.mrb[77].mxu0 }
 0xf57   : > { %v2910_v41 = vpop.f32.mrb[78].mxu0 }
 0xf58   : > { %v3971_v63 = vpop.f32.mrb[79].mxu0  ;;  %v2953_v0 = vpop.f32.mrb[80].mxu1  ;;  %v4237_v41 = vld [vmem:[%s5445_s5 + $0x20] sm:$0xff]  }
 0xf59   : > { %v4208_v1 = vpack.i.bf16 %v2953_v0, %v2907_v61  ;;  %v3976_v2 = vpop.f32.mrb[81].mxu1  ;;  %v4238_v63 = vld [vmem:[%s5445_s5 + $0x28] sm:$0xff]   ;;  %v4239_v0 = vld [vmem:[%s5445_s5 + $0x30] sm:$0xff]  }
 0xf5a   : > { %v2956_v3 = vpop.f32.mrb[82].mxu1  ;;  %v3575_v2 = vld [vmem:[%s5447_s7 + $0x1] ss:$0 sm:$0xff] }
 0xf5b   : > { %4209 = vrot.lane.b32.xlu1 %v4208_v1, %s4548_s15  ;;  %v3977_v49 = vpop.f32.mrb[83].mxu1  ;;  %v4240_v1 = vld [vmem:[%s5445_s5 + $0x38] sm:$0xff]  }
 0xf9c   : > { %v4200_v4 = vpop.permute.xlu1 %4199 }
 0xf9d   : > { %v4202_v6 = vunpack.i.h.bf16 %v4200_v4  ;;  %v4201_v7 = vunpack.i.l.bf16 %v4200_v4 }
 0xf9f   : > { %v2984_v11 = vsel %vm721_vm2, %v2677_v35, %v4202_v6  ;;  %v2983_v54 = vsel %vm721_vm2, %v2631_v30, %v4201_v7 }
 0xfa4   : > { %v4205_v5 = vpop.permute.xlu0 %4204 }
 0xfa5   : > { %v4207_v8 = vunpack.i.h.bf16 %v4205_v5  ;;  %v4206_v9 = vunpack.i.l.bf16 %v4205_v5 }
 0xfa7   : > { %v2986_v14 = vsel %vm1557_vm4, %v2984_v11, %v4207_v8  ;;  %v2985_v15 = vsel %vm1557_vm4, %v2983_v54, %v4206_v9 }
 0xfcd   : > { %v4210_v10 = vpop.permute.xlu1 %4209 }
 0xfce   : > { %v4212_v12 = vunpack.i.h.bf16 %v4210_v10  ;;  %v4211_v13 = vunpack.i.l.bf16 %v4210_v10 }
 0xfd0   : > { %v2988_v17 = vsel %vm1560_vm5, %v2986_v14, %v4212_v12  ;;  %v2987_v20 = vsel %vm1560_vm5, %v2985_v15, %v4211_v13 }
 0xfd1   : > { %v2989_v21 = vpack.c.bf16 %v2988_v17, %v2987_v20 }
 0xfd3   : > { %3983 = vmatmul.mubr.msk.bf16.vlgmr.msra.gmra.mrb[80].mxu0 %vm399_vm0, %v2989_v21 }
 0xfd4   : > { %4002 = vmatprep.mubr.msk.bf16.mxu0 %vm4542_vm1, %v4541_v16  ;;  %3995 = vmatpush3.bf16.msra.mxu0 %v4237_v41 }
 0xfd5   : > { %3996 = vmatprep.subr.bf16.mxu0 %v4541_v16 }
 0xfd8   : > { %3997 = vmatpush3.bf16.msra.mxu0 %v4238_v63 }
 0xfd9   : > { %3998 = vmatprep.subr.bf16.mxu0 %v4541_v16 }
 0xfdc   : > { %3999 = vmatpush3.bf16.msra.mxu0 %v4239_v0 }
 0xfdd   : > { %4000 = vmatprep.subr.bf16.mxu0 %v4541_v16 }
 0xfe0   : > { %4001 = vmatpush3.bf16.msra.mxu0 %v4240_v1 }
0x10a6   : > { %v3049_v23 = vpop.f32.mrb[80].mxu0 }
0x10a7   : > { %v3050_v24 = vadd.f32 %v3567_v22, %v3049_v23  ;;  %v3984_v25 = vpop.f32.mrb[81].mxu0 }
0x10a8   : > { %v3052_v26 = vpop.f32.mrb[82].mxu0 }
0x10a9   : > { %v3053_v27 = vadd.f32 %v3567_v22, %v3052_v26  ;;  %v3985_v28 = vpop.f32.mrb[83].mxu0  ;;  %v3056_v29 = vadd.f32 %v3050_v24, %v5133_v18 }
0x10aa   : > { %v3588_v28 = vld [vmem:[%s5446_s6 + $0x16] ss:$0 sm:$0xff] }
0x10ab   : > { %v3060_v30 = vsel %vm399_vm0, %v3056_v29, 0.0  ;;  %v3057_v31 = vadd.f32 %v3053_v27, %v5135_v19  ;;  %v4236_v19 = vld [vmem:[#allocation8 + $0x18] sm:$0xff]  }
0x10ac   : > { %3061 = vadd.xlane.f32.xlu0 %v3060_v30  ;;  %3989 = vmatpush3.bf16.msra.mxu1 %v4236_v19 }
0x10ad   : > { %v3063_v32 = vsel %vm399_vm0, %v3057_v31, 0.0 }
0x10ae   : > { %3064 = vadd.xlane.f32.xlu1 %v3063_v32 }
0x1139   : > { %v3062_v35 = vpop.xlane.xlu0 %3061 }
0x113a   : > { %v3066_v36 = vmul.f32 0.03125, %v3062_v35 }
0x113b   : > { %v3065_v37 = vpop.xlane.xlu1 %3064 }
0x113c   : > { %v3068_v38 = vsub.f32 %v3056_v29, %v3066_v36  ;;  %v3067_v39 = vmul.f32 0.03125, %v3065_v37 }
0x113e   : > { %v3069_v40 = vsub.f32 %v3057_v31, %v3067_v39  ;;  %v3070_v43 = vmul.f32 %v3068_v38, %v3068_v38 }
0x1140   : > { %v3072_v44 = vsel %vm399_vm0, %v3070_v43, 0.0  ;;  %v3071_v45 = vmul.f32 %v3069_v40, %v3069_v40 }
0x1141   : > { %3073 = vadd.xlane.f32.xlu0 %v3072_v44 }
0x1142   : > { %v3075_v18 = vsel %vm399_vm0, %v3071_v45, 0.0 }
0x1145   : > { %3076 = vadd.xlane.f32.xlu0 %v3075_v18 }
0x11ce   : > { %v3074_v47 = vpop.xlane.xlu0 %3073 }
0x11cf   : > { %v3078_v48 = vmul.f32 0.03125, %v3074_v47 }
0x11d1   : > { %v3080_v50 = vadd.f32 1e-12, %v3078_v48 }
0x11d2   : > { %v3077_v51 = vpop.xlane.xlu0 %3076 }
0x11d3   : > { %4321 = vrsqrt.f32 %v3080_v50  ;;  %v3079_v52 = vmul.f32 0.03125, %v3077_v51 }
0x11d5   : > { %v3081_v53 = vadd.f32 1e-12, %v3079_v52 }
0x11d7   : > { %4323 = vrsqrt.f32 %v3081_v53 }
0x11dd   : > { %v4322_v55 = vpop.eup %4321 }
0x11de   : > { %v3084_v56 = vmul.f32 %v4322_v55, %v3068_v38 }
0x11e0   : > { %v3090_v58 = vmul.f32 %v3573_v42, %v3084_v56 }
0x11e1   : > { %v4324_v57 = vpop.eup %4323 }
0x11e2   : > { %v3085_v33 = vmul.f32 %v4324_v57, %v3069_v40  ;;  %v3096_v60 = vadd.f32 %v3574_v59, %v3090_v58 }
0x11e4   : > { %v3091_v34 = vmul.f32 %v3573_v42, %v3085_v33  ;;  %v3596_v33 = vld [vmem:[%s5446_s6 + $0x17] ss:$0 sm:$0xff] }
0x11e6   : > { %v3097_v61 = vadd.f32 %v3574_v59, %v3091_v34 }
0x11e8   : > { %v3098_v62 = vpack.c.bf16 %v3097_v61, %v3096_v60 }
0x11ea   : > { %3991 = vmatmul.mubr.msk.bf16.vlgmr.msra.gmra.mrb[84].mxu1 %vm399_vm0, %v3098_v62 }
0x12bd   : > { %v3158_v3 = vpop.f32.mrb[84].mxu1 }
0x12be   : > { %v3159_v49 = vadd.f32 %v3575_v2, %v3158_v3  ;;  %v3992_v4 = vpop.f32.mrb[85].mxu1 }
0x12bf   : > { %v3161_v5 = vpop.f32.mrb[86].mxu1 }
0x12c0   : > { %v3167_v6 = vmul.f32 0.044715, %v3159_v49  ;;  %v3162_v7 = vadd.f32 %v3575_v2, %v3161_v5  ;;  %v3993_v8 = vpop.f32.mrb[87].mxu1  ;;  %v3165_v22 = vmul.f32 0.5, %v3159_v49 }
0x12c2   : > { %v3169_v9 = vmul.f32 %v3167_v6, %v3159_v49  ;;  %v3168_v10 = vmul.f32 0.044715, %v3162_v7  ;;  %v3166_v23 = vmul.f32 0.5, %v3162_v7 }
0x12c4   : > { %v3171_v11 = vmul.f32 %v3169_v9, %v3159_v49  ;;  %v3170_v54 = vmul.f32 %v3168_v10, %v3162_v7 }
0x12c6   : > { %v3173_v12 = vadd.f32 %v3171_v11, %v3159_v49  ;;  %v3172_v13 = vmul.f32 %v3170_v54, %v3162_v7 }
0x12c8   : > { %v3175_v14 = vmul.f32 0.7978846, %v3173_v12  ;;  %v3174_v16 = vadd.f32 %v3172_v13, %v3162_v7 }
0x12ca   : > { %4325 = vtanh.f32 %v3175_v14  ;;  %v3176_v15 = vmul.f32 0.7978846, %v3174_v16 }
0x12cc   : > { %4327 = vtanh.f32 %v3176_v15 }
0x12d4   : > { %v4326_v17 = vpop.eup %4325 }
0x12d5   : > { %v3179_v20 = vadd.f32 1.0, %v4326_v17 }
0x12d6   : > { %v4328_v21 = vpop.eup %4327 }
0x12d7   : > { %v3180_v24 = vadd.f32 1.0, %v4328_v21  ;;  %v3181_v25 = vmul.f32 %v3179_v20, %v3165_v22 }
0x12d9   : > { %v3182_v26 = vmul.f32 %v3180_v24, %v3166_v23 }
0x12db   : > { %v3183_v27 = vpack.c.bf16 %v3182_v26, %v3181_v25 }
0x12dd   : > { %4003 = vmatmul.mubr.msk.bf16.vlgmr.msra.gmra.mrb[84].mxu0 %vm1794_vm6, %v3183_v27 }
0x13b0   : > { %v3259_v29 = vpop.f32.mrb[84].mxu0 }
0x13b1   : > { %v3260_v30 = vadd.f32 %v3588_v28, %v3259_v29  ;;  %v4004_v31 = vpop.f32.mrb[85].mxu0 }
0x13b2   : > { %v3262_v32 = vpop.f32.mrb[86].mxu0 }
0x13b3   : > { %v3263_v35 = vadd.f32 %v3588_v28, %v3262_v32  ;;  %v4005_v36 = vpop.f32.mrb[87].mxu0  ;;  %v3266_v37 = vadd.f32 %v3260_v30, %v3096_v60  ;;  %v3597_v60 = vld [vmem:[%s5446_s6 + $0x18] ss:$0 sm:$0xff] }
0x13b5   : > { %v3270_v38 = vsel %vm399_vm0, %v3266_v37, 0.0  ;;  %v3267_v39 = vadd.f32 %v3263_v35, %v3097_v61 }
0x13b6   : > { %3271 = vadd.xlane.f32.xlu0 %v3270_v38 }
0x13b7   : > { %v3273_v40 = vsel %vm399_vm0, %v3267_v39, 0.0 }
0x13b8   : > { %3274 = vadd.xlane.f32.xlu1 %v3273_v40 }
0x1443   : > { %v3272_v43 = vpop.xlane.xlu0 %3271 }
0x1444   : > { %v3276_v44 = vmul.f32 0.03125, %v3272_v43 }
0x1445   : > { %v3275_v45 = vpop.xlane.xlu1 %3274 }
0x1446   : > { %v3278_v18 = vsub.f32 %v3266_v37, %v3276_v44  ;;  %v3277_v46 = vmul.f32 0.03125, %v3275_v45 }
0x1448   : > { %v3279_v19 = vsub.f32 %v3267_v39, %v3277_v46  ;;  %v3280_v47 = vmul.f32 %v3278_v18, %v3278_v18 }
0x144a   : > { %v3282_v48 = vsel %vm399_vm0, %v3280_v47, 0.0  ;;  %v3281_v50 = vmul.f32 %v3279_v19, %v3279_v19 }
0x144b   : > { %3283 = vadd.xlane.f32.xlu0 %v3282_v48 }
0x144c   : > { %v3285_v51 = vsel %vm399_vm0, %v3281_v50, 0.0 }
0x144d   : > { %3286 = vadd.xlane.f32.xlu1 %v3285_v51 }
0x14d8   : > { %v3284_v52 = vpop.xlane.xlu0 %3283 }
0x14d9   : > { %v3288_v53 = vmul.f32 0.03125, %v3284_v52 }
0x14da   : > { %v3287_v55 = vpop.xlane.xlu1 %3286 }
0x14db   : > { %v3290_v56 = vadd.f32 1e-12, %v3288_v53  ;;  %v3289_v42 = vmul.f32 0.03125, %v3287_v55 }
0x14dd   : > { %4329 = vrsqrt.f32 %v3290_v56  ;;  %v3291_v57 = vadd.f32 1e-12, %v3289_v42 }
0x14df   : > { %4331 = vrsqrt.f32 %v3291_v57 }
0x14e7   : > { %v4330_v58 = vpop.eup %4329 }
0x14e8   : > { %v3294_v59 = vmul.f32 %v4330_v58, %v3278_v18 }
0x14e9   : > { %v4332_v34 = vpop.eup %4331 }
0x14ea   : > { %v3300_v61 = vmul.f32 %v3596_v33, %v3294_v59  ;;  %v3295_v62 = vmul.f32 %v4332_v34, %v3279_v19 }
0x14ec   : > { %v3306_v41 = vadd.f32 %v3597_v60, %v3300_v61  ;;  %v3301_v63 = vmul.f32 %v3596_v33, %v3295_v62 }
0x14ee   : > { %v3307_v0 = vadd.f32 %v3597_v60, %v3301_v63  ;;  %3309 = vst.msk [vmem:[%s390_s20] sm:$0x1] %vm3308_vm7, %v3306_v41 }
0x14f0   : > { %3310 = vst.msk [vmem:[%s390_s20 + $0x1] sm:$0x1] %vm3308_vm7, %v3307_v0 }
0x14f1   : > { %4464 = shalt.err (!%p4461_p5)
}
0x14f2   : > { %s4465_s27 = scalar_lea.hbm %s5392_s26, 32  ;;  %s4469_s2 = scalar_lea.hbm %s5448_s8, 64 }
0x14f3   : > { %p4466_p6 = scmp.ne.s32.totalorder %s5392_s26, %s4465_s27  ;;  %p4470_p10 = scmp.lt.u32.totalorder %s5392_s26, %s5448_s8 }
0x14f4   : > { %p4471_p2 = scmp.lt.u32.totalorder %s4469_s2, %s4465_s27  ;;  %p4473_p9 = scmp.lt.u32.totalorder %s4465_s27, %s5392_s26 }
0x14f5   : > { %p4467_p8 = pnand %p4466_p6, %p5481_p11 }
0x14f6   : > { %p4472_p0 = por %p4471_p2, %p4470_p10 }
0x14f7   : > { %p4468_p7 = pneg %p4467_p8 }
0x14f8   : > { %p4474_p13 = por %p4473_p9, %p4472_p0 }
0x14fa   : > { %p4475_p1 = pnand %p4474_p13, %p4468_p7 }
0x14fc   : > { %4478 = shalt.err (!%p4475_p1)
}
0x14fd   : > { %s4550_s10 = smov 1  }
0x14fe   : > { %4018 = dma.vmem_to_hbm [thread:$0]  (%p5481_p11), %s5394_s22, 32, %s5392_s26, %s3312_s9, %s4547_s11, %s4547_s11, %s4550_s10  }
0x14ff PF: > { %s5482_s16 = sld [smem:[#allocation16_spill]]  ;;  %s5483_s20 = sld [smem:[#allocation20_spill]] }
0x1500   : > { %p5485_p3 = scmp.ge.s32.totalorder %s4529_s30, 2 }
0x1505   : > { %s3340_s21 = sand.u32 1, %s5482_s16   ;;  %p5484_p12 = scmp.ne.s32.totalorder %s5483_s20, 0 }
0x1506   : > { %s3341_s18 = scalar_lea.sflag [#allocation4], %s3340_s21 }
0x1507   : > { %p4035_p4 = pnand %p5485_p3, %p5484_p12 }
0x1509   : > { %4512 = dma.done.wait (!%p4035_p4), %s3341_s18, 32  }
0x150a   : > { %4514 = vsyncadd (!%p4035_p4), %s3341_s18, 4294967264  ;;  %s5486_s30 = sld [smem:[#allocation18_spill]]  ;;  %s5487_s17 = sld [smem:[#allocation17_spill]] }
0x150b   : > { %s5488_s29 = sld [smem:[#allocation19_spill]]  ;;  %s5489_s27 = smov %s4521_s28 }
0x1510   : > { %p25_p5 = scmp.ge.s32.totalorder %s5486_s30, 4   ;;  %s5490_s28 = smov %s5487_s17 }
0x1512   :  { %27 = sbr.rel (!%p25_p5) target bundleno = 10 (0xa), region = 128 }
0x1519   :  { %3346 = vsyncpa [#allocation3], 1 }
0x151a   :  { %3348 = vsyncpa [#allocation3 + $0x1], 1 }
0x151b   :  { %3349 = vsyncpa [#allocation6], 1 }
0x151c   :  { %3351 = vsyncpa [#allocation6 + $0x1], 1 }
0x151d   :  { %3352 = vsyncpa [#allocation9], 1 }
0x151e   :  { %3353 = vsyncpa [#allocation4], 1 }
0x151f   :  { %3355 = vsyncpa [#allocation4 + $0x1], 1 }

</bundles_post_ra>
